<compile_context>
chip_gen: v5e
topology: v5e:2x2
jax: 0.10.0
libtpu: 0.0.40
codegen_flags: <defaults>
</compile_context>

<pallas_src>
import functools
from math import sqrt

import jax
import jax.numpy as jnp
from jax import lax
from jax.experimental import pallas as pl
from jax.experimental.pallas import tpu as pltpu


# ----------------------------- fused kernel ---------------------------------

def _attention_layer_kernel(xq_ref, xk_ref, xv_ref,
                            wq_ref, wk_ref, wv_ref,
                            bq_ref, bk_ref, bv_ref,
                            wo_ref, bo_ref,
                            out_ref, *rest,
                            n_heads, d_keys, d_values, output_attention):
    if output_attention:
        attn_ref, q_scr, k_scr, v_scr, ctx_scr = rest
    else:
        attn_ref = None
        q_scr, k_scr, v_scr, ctx_scr = rest

    xq = xq_ref[0]                       # (L, d_model)
    xk = xk_ref[0]                       # (S, d_model)
    xv = xv_ref[0]                       # (S, d_model)

    # --- full-width projections (N = H*E = 128 lanes; scale folded into wq/bq)
    q_scr[...] = (jnp.dot(xq, wq_ref[...], preferred_element_type=jnp.float32)
                  + bq_ref[...]).astype(q_scr.dtype)
    k_scr[...] = (jnp.dot(xk, wk_ref[...], preferred_element_type=jnp.float32)
                  + bk_ref[...]).astype(k_scr.dtype)
    v_scr[...] = (jnp.dot(xv, wv_ref[...], preferred_element_type=jnp.float32)
                  + bv_ref[...]).astype(v_scr.dtype)

    E, D = d_keys, d_values
    for h in range(n_heads):             # static unroll; all lane offsets static
        qh = q_scr[:, h * E:(h + 1) * E]   # (L, E)
        kh = k_scr[:, h * E:(h + 1) * E]   # (S, E)
        vh = v_scr[:, h * D:(h + 1) * D]   # (S, D)

        # scores = (scaled q) @ k^T, contracting the last axes (no transpose).
        s = lax.dot_general(qh, kh, (((1,), (1,)), ((), ())),
                            preferred_element_type=jnp.float32)        # (L, S)

        m = jnp.max(s, axis=-1, keepdims=True)
        e = jnp.exp(s - m)
        a = e / jnp.sum(e, axis=-1, keepdims=True)                      # exact softmax

        if attn_ref is not None:
            attn_ref[0, h] = a.astype(attn_ref.dtype)

        ctx = jnp.dot(a.astype(vh.dtype), vh,
                      preferred_element_type=jnp.float32)               # (L, D)
        # Assemble a lane-dense (L, H*D=128) context block.
        ctx_scr[:, h * D:(h + 1) * D] = ctx.astype(ctx_scr.dtype)

    # --- single K=128 output projection, lane-dense (L, d_model) output.
    out = jnp.dot(ctx_scr[...], wo_ref[...],
                  preferred_element_type=jnp.float32) + bo_ref[...]
    out_ref[0] = out.astype(out_ref.dtype)


# ----------------------------- wrapper ---------------------------------------

def attention_layer(queries, keys, values, params, n_heads,
                    output_attention=True, compute_dtype=None):
    """Fused Pallas implementation of AttentionLayer.forward. Returns (out, attn)."""
    B, L, d_model = queries.shape
    _, S, _ = keys.shape
    H = n_heads
    HE = params["wq"].shape[1]
    HD = params["wv"].shape[1]
    E = HE // H
    D = HD // H
    d_out = params["wo"].shape[1]
    cdt = compute_dtype or queries.dtype

    # Fold the 1/sqrt(E) softmax scale into the query projection (weights + bias).
    scale = 1.0 / sqrt(E)
    wq = (params["wq"] * scale).astype(cdt)
    wk = params["wk"].astype(cdt)
    wv = params["wv"].astype(cdt)
    wo = params["wo"].astype(cdt)
    bq = (params["bq"] * scale).reshape(1, HE).astype(jnp.float32)
    bk = params["bk"].reshape(1, HE).astype(jnp.float32)
    bv = params["bv"].reshape(1, HD).astype(jnp.float32)
    bo = params["bo"].reshape(1, d_out).astype(jnp.float32)

    xq = queries.astype(cdt)
    xk = keys.astype(cdt)
    xv = values.astype(cdt)

    kernel = functools.partial(_attention_layer_kernel,
                               n_heads=H, d_keys=E, d_values=D,
                               output_attention=output_attention)

    in_specs = [
        pl.BlockSpec((1, L, d_model), lambda b: (b, 0, 0)),
        pl.BlockSpec((1, S, d_model), lambda b: (b, 0, 0)),
        pl.BlockSpec((1, S, d_model), lambda b: (b, 0, 0)),
        pl.BlockSpec((d_model, HE), lambda b: (0, 0)),
        pl.BlockSpec((d_model, HE), lambda b: (0, 0)),
        pl.BlockSpec((d_model, HD), lambda b: (0, 0)),
        pl.BlockSpec((1, HE), lambda b: (0, 0)),
        pl.BlockSpec((1, HE), lambda b: (0, 0)),
        pl.BlockSpec((1, HD), lambda b: (0, 0)),
        pl.BlockSpec((HD, d_out), lambda b: (0, 0)),
        pl.BlockSpec((1, d_out), lambda b: (0, 0)),
    ]
    out_spec_o = pl.BlockSpec((1, L, d_out), lambda b: (b, 0, 0))
    out_shape_o = jax.ShapeDtypeStruct((B, L, d_out), queries.dtype)

    if output_attention:
        out_shape = (out_shape_o,
                     jax.ShapeDtypeStruct((B, H, L, S), queries.dtype))
        out_specs = (out_spec_o,
                     pl.BlockSpec((1, H, L, S), lambda b: (b, 0, 0, 0)))
    else:
        out_shape = out_shape_o
        out_specs = out_spec_o

    scratch_shapes = [
        pltpu.VMEM((L, HE), cdt),   # projected q (scaled)
        pltpu.VMEM((S, HE), cdt),   # projected k
        pltpu.VMEM((S, HD), cdt),   # projected v
        pltpu.VMEM((L, HD), cdt),   # lane-dense per-head context
    ]

    result = pl.pallas_call(
        kernel,
        out_shape=out_shape,
        grid=(B,),
        in_specs=in_specs,
        out_specs=out_specs,
        scratch_shapes=scratch_shapes,
        compiler_params=pltpu.CompilerParams(
            dimension_semantics=("parallel",)),
    )(xq, xk, xv, wq, wk, wv, bq, bk, bv, wo, bo)

    if output_attention:
        out, attn = result
        return out, attn
    return result, None


# ----------------------------- param init -----------------------------------

def init_params(key, d_model, n_heads):
    d_keys = d_model // n_heads
    d_values = d_model // n_heads
    dims = {
        "q": (d_model, d_keys * n_heads),
        "k": (d_model, d_keys * n_heads),
        "v": (d_model, d_values * n_heads),
        "o": (d_values * n_heads, d_model),
    }
    params = {}
    for name, (fan_in, fan_out) in dims.items():
        key, kw, kb = jax.random.split(key, 3)
        bound = 1.0 / sqrt(fan_in)
        params["w" + name] = jax.random.uniform(
            kw, (fan_in, fan_out), jnp.float32, -bound, bound)
        params["b" + name] = jax.random.uniform(
            kb, (fan_out,), jnp.float32, -bound, bound)
    return params


# ----------------------------- reference (pure JAX) --------------------------

def reference(queries, keys, values, params, n_heads):
    B, L, d_model = queries.shape
    _, S, _ = keys.shape
    H = n_heads
    q = (queries @ params["wq"] + params["bq"]).reshape(B, L, H, -1)
    k = (keys @ params["wk"] + params["bk"]).reshape(B, S, H, -1)
    v = (values @ params["wv"] + params["bv"]).reshape(B, S, H, -1)
    E = q.shape[-1]
    scale = 1.0 / sqrt(E)
    scores = jnp.einsum("blhe,bshe->bhls", q, k)
    A = jax.nn.softmax(scale * scores, axis=-1)
    V = jnp.einsum("bhls,bshd->blhd", A, v)
    out = V.reshape(B, L, -1) @ params["wo"] + params["bo"]
    return out, A


# ----------------------------- main ------------------------------------------

if __name__ == "__main__":
    B, L, S = 2, 8, 8
    d_model, n_heads = 128, 8

    root = jax.random.PRNGKey(0)
    kq, kk, kv, kp = jax.random.split(root, 4)
    queries = jax.random.normal(kq, (B, L, d_model), jnp.float32)
    keys = jax.random.normal(kk, (B, S, d_model), jnp.float32)
    values = jax.random.normal(kv, (B, S, d_model), jnp.float32)
    params = init_params(kp, d_model, n_heads)

    # f32 path with attention output.
    fwd = jax.jit(functools.partial(
        attention_layer, n_heads=n_heads, output_attention=True))
    out, attn = fwd(queries, keys, values, params)
    out = jax.block_until_ready(out)
    attn = jax.block_until_ready(attn)

    # attn-free path (skips the (B,H,L,S) HBM writeback).
    fwd_noattn = jax.jit(functools.partial(
        attention_layer, n_heads=n_heads, output_attention=False))
    out2, _ = fwd_noattn(queries, keys, values, params)
    out2 = jax.block_until_ready(out2)

    # bf16 compute path (v6e/v7x throughput mode) — smoke test, loose tolerance.
    fwd_bf16 = jax.jit(functools.partial(
        attention_layer, n_heads=n_heads, output_attention=False,
        compute_dtype=jnp.bfloat16))
    out_bf16, _ = fwd_bf16(queries, keys, values, params)
    out_bf16 = jax.block_until_ready(out_bf16)

    ref_out, ref_attn = reference(queries, keys, values, params, n_heads)
    assert out.shape == (B, L, d_model)
    assert attn.shape == (B, n_heads, L, S)
    assert jnp.allclose(out, ref_out, atol=5e-3, rtol=5e-3)
    assert jnp.allclose(attn, ref_attn, atol=1e-3, rtol=1e-3)
    assert jnp.allclose(out2, out, atol=1e-5, rtol=1e-5)
    assert out_bf16.shape == (B, L, d_model)
    assert jnp.allclose(out_bf16.astype(jnp.float32), ref_out, atol=1e-1, rtol=1e-1)

    print("KERNEL_OK")
</pallas_src>

<mosaic_0001>
module attributes {stable_mosaic.version = 11 : i64} {
  func.func @_attention_layer_kernel(%arg0: i32, %arg1: memref<1x8x128xf32, #tpu.memory_space<vmem>>, %arg2: memref<1x8x128xf32, #tpu.memory_space<vmem>>, %arg3: memref<1x8x128xf32, #tpu.memory_space<vmem>>, %arg4: memref<128x128xf32, #tpu.memory_space<vmem>>, %arg5: memref<128x128xf32, #tpu.memory_space<vmem>>, %arg6: memref<128x128xf32, #tpu.memory_space<vmem>>, %arg7: memref<1x128xf32, #tpu.memory_space<vmem>>, %arg8: memref<1x128xf32, #tpu.memory_space<vmem>>, %arg9: memref<1x128xf32, #tpu.memory_space<vmem>>, %arg10: memref<128x128xf32, #tpu.memory_space<vmem>>, %arg11: memref<1x128xf32, #tpu.memory_space<vmem>>, %arg12: memref<1x8x128xf32, #tpu.memory_space<vmem>>, %arg13: memref<1x8x8x8xf32, #tpu.memory_space<vmem>>, %arg14: memref<8x128xf32, #tpu.memory_space<vmem>>, %arg15: memref<8x128xf32, #tpu.memory_space<vmem>>, %arg16: memref<8x128xf32, #tpu.memory_space<vmem>>, %arg17: memref<8x128xf32, #tpu.memory_space<vmem>>) attributes {dimension_semantics = [#tpu.dimension_semantics<parallel>], iteration_bounds = array<i64: 2>, scalar_prefetch = 0 : i64, scratch_operands = 4 : i64, tpu.core_type = #tpu.core_type<tc>, window_params = [{transform_indices = @transform_0, window_bounds = array<i64: 1, 8, 128>}, {transform_indices = @transform_1, window_bounds = array<i64: 1, 8, 128>}, {transform_indices = @transform_2, window_bounds = array<i64: 1, 8, 128>}, {pipeline_mode = #tpu.pipeline_mode<synchronous>, transform_indices = @transform_3, window_bounds = array<i64: 128, 128>}, {pipeline_mode = #tpu.pipeline_mode<synchronous>, transform_indices = @transform_4, window_bounds = array<i64: 128, 128>}, {pipeline_mode = #tpu.pipeline_mode<synchronous>, transform_indices = @transform_5, window_bounds = array<i64: 128, 128>}, {pipeline_mode = #tpu.pipeline_mode<synchronous>, transform_indices = @transform_6, window_bounds = array<i64: 1, 128>}, {pipeline_mode = #tpu.pipeline_mode<synchronous>, transform_indices = @transform_7, window_bounds = array<i64: 1, 128>}, {pipeline_mode = #tpu.pipeline_mode<synchronous>, transform_indices = @transform_8, window_bounds = array<i64: 1, 128>}, {pipeline_mode = #tpu.pipeline_mode<synchronous>, transform_indices = @transform_9, window_bounds = array<i64: 128, 128>}, {pipeline_mode = #tpu.pipeline_mode<synchronous>, transform_indices = @transform_10, window_bounds = array<i64: 1, 128>}, {transform_indices = @transform_11, window_bounds = array<i64: 1, 8, 128>}, {transform_indices = @transform_12, window_bounds = array<i64: 1, 8, 8, 8>}]} {
    %c0 = arith.constant 0 : index
    %c0_0 = arith.constant 0 : index
    %c0_1 = arith.constant 0 : index
    %0 = vector.load %arg1[%c0, %c0_0, %c0_1] : memref<1x8x128xf32, #tpu.memory_space<vmem>>, vector<1x8x128xf32>
    %1 = vector.shape_cast %0 : vector<1x8x128xf32> to vector<8x128xf32>
    %c0_2 = arith.constant 0 : index
    %c0_3 = arith.constant 0 : index
    %c0_4 = arith.constant 0 : index
    %2 = vector.load %arg2[%c0_2, %c0_3, %c0_4] : memref<1x8x128xf32, #tpu.memory_space<vmem>>, vector<1x8x128xf32>
    %3 = vector.shape_cast %2 : vector<1x8x128xf32> to vector<8x128xf32>
    %c0_5 = arith.constant 0 : index
    %c0_6 = arith.constant 0 : index
    %c0_7 = arith.constant 0 : index
    %4 = vector.load %arg3[%c0_5, %c0_6, %c0_7] : memref<1x8x128xf32, #tpu.memory_space<vmem>>, vector<1x8x128xf32>
    %5 = vector.shape_cast %4 : vector<1x8x128xf32> to vector<8x128xf32>
    %c0_8 = arith.constant 0 : index
    %c0_9 = arith.constant 0 : index
    %6 = vector.load %arg4[%c0_8, %c0_9] : memref<128x128xf32, #tpu.memory_space<vmem>>, vector<128x128xf32>
    %cst = arith.constant dense<0.000000e+00> : vector<8x128xf32>
    %7 = tpu.matmul %1, %6, %cst {dimension_numbers = #tpu.dot_dimension_numbers<[1], [0], [0], [1], [0, 0, 1, 1], [], []>} : vector<8x128xf32>, vector<128x128xf32>, vector<8x128xf32> -> vector<8x128xf32>
    %c0_10 = arith.constant 0 : index
    %c0_11 = arith.constant 0 : index
    %8 = vector.load %arg7[%c0_10, %c0_11] : memref<1x128xf32, #tpu.memory_space<vmem>>, vector<1x128xf32>
    %9 = vector.broadcast %8 : vector<1x128xf32> to vector<8x128xf32>
    %10 = arith.addf %7, %9 : vector<8x128xf32>
    %c0_12 = arith.constant 0 : index
    %c0_13 = arith.constant 0 : index
    %11 = vector.load %arg14[%c0_12, %c0_13] : memref<8x128xf32, #tpu.memory_space<vmem>>, vector<8x128xf32>
    tpu.vector_store %arg14[%c0_12, %c0_13], %10 {strides = array<i32>} : memref<8x128xf32, #tpu.memory_space<vmem>>, vector<8x128xf32>,
    %c0_14 = arith.constant 0 : index
    %c0_15 = arith.constant 0 : index
    %12 = vector.load %arg5[%c0_14, %c0_15] : memref<128x128xf32, #tpu.memory_space<vmem>>, vector<128x128xf32>
    %cst_16 = arith.constant dense<0.000000e+00> : vector<8x128xf32>
    %13 = tpu.matmul %3, %12, %cst_16 {dimension_numbers = #tpu.dot_dimension_numbers<[1], [0], [0], [1], [0, 0, 1, 1], [], []>} : vector<8x128xf32>, vector<128x128xf32>, vector<8x128xf32> -> vector<8x128xf32>
    %c0_17 = arith.constant 0 : index
    %c0_18 = arith.constant 0 : index
    %14 = vector.load %arg8[%c0_17, %c0_18] : memref<1x128xf32, #tpu.memory_space<vmem>>, vector<1x128xf32>
    %15 = vector.broadcast %14 : vector<1x128xf32> to vector<8x128xf32>
    %16 = arith.addf %13, %15 : vector<8x128xf32>
    %c0_19 = arith.constant 0 : index
    %c0_20 = arith.constant 0 : index
    %17 = vector.load %arg15[%c0_19, %c0_20] : memref<8x128xf32, #tpu.memory_space<vmem>>, vector<8x128xf32>
    tpu.vector_store %arg15[%c0_19, %c0_20], %16 {strides = array<i32>} : memref<8x128xf32, #tpu.memory_space<vmem>>, vector<8x128xf32>,
    %c0_21 = arith.constant 0 : index
    %c0_22 = arith.constant 0 : index
    %18 = vector.load %arg6[%c0_21, %c0_22] : memref<128x128xf32, #tpu.memory_space<vmem>>, vector<128x128xf32>
    %cst_23 = arith.constant dense<0.000000e+00> : vector<8x128xf32>
    %19 = tpu.matmul %5, %18, %cst_23 {dimension_numbers = #tpu.dot_dimension_numbers<[1], [0], [0], [1], [0, 0, 1, 1], [], []>} : vector<8x128xf32>, vector<128x128xf32>, vector<8x128xf32> -> vector<8x128xf32>
    %c0_24 = arith.constant 0 : index
    %c0_25 = arith.constant 0 : index
    %20 = vector.load %arg9[%c0_24, %c0_25] : memref<1x128xf32, #tpu.memory_space<vmem>>, vector<1x128xf32>
    %21 = vector.broadcast %20 : vector<1x128xf32> to vector<8x128xf32>
    %22 = arith.addf %19, %21 : vector<8x128xf32>
    %c0_26 = arith.constant 0 : index
    %c0_27 = arith.constant 0 : index
    %23 = vector.load %arg16[%c0_26, %c0_27] : memref<8x128xf32, #tpu.memory_space<vmem>>, vector<8x128xf32>
    tpu.vector_store %arg16[%c0_26, %c0_27], %22 {strides = array<i32>} : memref<8x128xf32, #tpu.memory_space<vmem>>, vector<8x128xf32>,
    %c0_28 = arith.constant 0 : index
    %c0_29 = arith.constant 0 : index
    %24 = vector.load %arg14[%c0_28, %c0_29] : memref<8x128xf32, #tpu.memory_space<vmem>>, vector<8x16xf32>
    %c0_30 = arith.constant 0 : index
    %c0_31 = arith.constant 0 : index
    %25 = vector.load %arg15[%c0_30, %c0_31] : memref<8x128xf32, #tpu.memory_space<vmem>>, vector<8x16xf32>
    %c0_32 = arith.constant 0 : index
    %c0_33 = arith.constant 0 : index
    %26 = vector.load %arg16[%c0_32, %c0_33] : memref<8x128xf32, #tpu.memory_space<vmem>>, vector<8x16xf32>
    %cst_34 = arith.constant dense<0.000000e+00> : vector<8x8xf32>
    %27 = tpu.matmul %24, %25, %cst_34 {dimension_numbers = #tpu.dot_dimension_numbers<[1], [1], [0], [0], [0, 0, 1, 0], [], []>} : vector<8x16xf32>, vector<8x16xf32>, vector<8x8xf32> -> vector<8x8xf32>
    %cst_35 = arith.constant dense<0xFF800000> : vector<8xf32>
    %28 = vector.multi_reduction <maximumf>, %27, %cst_35 [1] : vector<8x8xf32> to vector<8xf32>
    %29 = vector.shape_cast %28 : vector<8xf32> to vector<8x1xf32>
    %30 = vector.broadcast %29 : vector<8x1xf32> to vector<8x8xf32>
    %31 = arith.subf %27, %30 : vector<8x8xf32>
    %32 = math.exp %31 : vector<8x8xf32>
    %cst_36 = arith.constant dense<0.000000e+00> : vector<8xf32>
    %33 = vector.multi_reduction <add>, %32, %cst_36 [1] : vector<8x8xf32> to vector<8xf32>
    %34 = vector.shape_cast %33 : vector<8xf32> to vector<8x1xf32>
    %35 = vector.broadcast %34 : vector<8x1xf32> to vector<8x8xf32>
    %36 = arith.divf %32, %35 : vector<8x8xf32>
    %c0_37 = arith.constant 0 : index
    %c0_38 = arith.constant 0 : index
    %c0_39 = arith.constant 0 : index
    %c0_40 = arith.constant 0 : index
    %37 = vector.load %arg13[%c0_37, %c0_38, %c0_39, %c0_40] : memref<1x8x8x8xf32, #tpu.memory_space<vmem>>, vector<1x1x8x8xf32>
    %38 = vector.shape_cast %37 : vector<1x1x8x8xf32> to vector<8x8xf32>
    %39 = vector.shape_cast %36 : vector<8x8xf32> to vector<1x1x8x8xf32>
    tpu.vector_store %arg13[%c0_37, %c0_38, %c0_39, %c0_40], %39 {strides = array<i32>} : memref<1x8x8x8xf32, #tpu.memory_space<vmem>>, vector<1x1x8x8xf32>,
    %cst_41 = arith.constant dense<0.000000e+00> : vector<8x16xf32>
    %40 = tpu.matmul %36, %26, %cst_41 {dimension_numbers = #tpu.dot_dimension_numbers<[1], [0], [0], [1], [0, 0, 1, 1], [], []>} : vector<8x8xf32>, vector<8x16xf32>, vector<8x16xf32> -> vector<8x16xf32>
    %c0_42 = arith.constant 0 : index
    %c0_43 = arith.constant 0 : index
    %41 = vector.load %arg17[%c0_42, %c0_43] : memref<8x128xf32, #tpu.memory_space<vmem>>, vector<8x16xf32>
    tpu.vector_store %arg17[%c0_42, %c0_43], %40 {strides = array<i32>} : memref<8x128xf32, #tpu.memory_space<vmem>>, vector<8x16xf32>,
    %c0_44 = arith.constant 0 : index
    %c16 = arith.constant 16 : index
    %42 = vector.load %arg14[%c0_44, %c16] : memref<8x128xf32, #tpu.memory_space<vmem>>, vector<8x16xf32>
    %c0_45 = arith.constant 0 : index
    %c16_46 = arith.constant 16 : index
    %43 = vector.load %arg15[%c0_45, %c16_46] : memref<8x128xf32, #tpu.memory_space<vmem>>, vector<8x16xf32>
    %c0_47 = arith.constant 0 : index
    %c16_48 = arith.constant 16 : index
    %44 = vector.load %arg16[%c0_47, %c16_48] : memref<8x128xf32, #tpu.memory_space<vmem>>, vector<8x16xf32>
    %cst_49 = arith.constant dense<0.000000e+00> : vector<8x8xf32>
    %45 = tpu.matmul %42, %43, %cst_49 {dimension_numbers = #tpu.dot_dimension_numbers<[1], [1], [0], [0], [0, 0, 1, 0], [], []>} : vector<8x16xf32>, vector<8x16xf32>, vector<8x8xf32> -> vector<8x8xf32>
    %cst_50 = arith.constant dense<0xFF800000> : vector<8xf32>
    %46 = vector.multi_reduction <maximumf>, %45, %cst_50 [1] : vector<8x8xf32> to vector<8xf32>
    %47 = vector.shape_cast %46 : vector<8xf32> to vector<8x1xf32>
    %48 = vector.broadcast %47 : vector<8x1xf32> to vector<8x8xf32>
    %49 = arith.subf %45, %48 : vector<8x8xf32>
    %50 = math.exp %49 : vector<8x8xf32>
    %cst_51 = arith.constant dense<0.000000e+00> : vector<8xf32>
    %51 = vector.multi_reduction <add>, %50, %cst_51 [1] : vector<8x8xf32> to vector<8xf32>
    %52 = vector.shape_cast %51 : vector<8xf32> to vector<8x1xf32>
    %53 = vector.broadcast %52 : vector<8x1xf32> to vector<8x8xf32>
    %54 = arith.divf %50, %53 : vector<8x8xf32>
    %c0_52 = arith.constant 0 : index
    %c1 = arith.constant 1 : index
    %c0_53 = arith.constant 0 : index
    %c0_54 = arith.constant 0 : index
    %55 = vector.load %arg13[%c0_52, %c1, %c0_53, %c0_54] : memref<1x8x8x8xf32, #tpu.memory_space<vmem>>, vector<1x1x8x8xf32>
    %56 = vector.shape_cast %55 : vector<1x1x8x8xf32> to vector<8x8xf32>
    %57 = vector.shape_cast %54 : vector<8x8xf32> to vector<1x1x8x8xf32>
    tpu.vector_store %arg13[%c0_52, %c1, %c0_53, %c0_54], %57 {strides = array<i32>} : memref<1x8x8x8xf32, #tpu.memory_space<vmem>>, vector<1x1x8x8xf32>,
    %cst_55 = arith.constant dense<0.000000e+00> : vector<8x16xf32>
    %58 = tpu.matmul %54, %44, %cst_55 {dimension_numbers = #tpu.dot_dimension_numbers<[1], [0], [0], [1], [0, 0, 1, 1], [], []>} : vector<8x8xf32>, vector<8x16xf32>, vector<8x16xf32> -> vector<8x16xf32>
    %c0_56 = arith.constant 0 : index
    %c16_57 = arith.constant 16 : index
    %59 = vector.load %arg17[%c0_56, %c16_57] : memref<8x128xf32, #tpu.memory_space<vmem>>, vector<8x16xf32>
    tpu.vector_store %arg17[%c0_56, %c16_57], %58 {strides = array<i32>} : memref<8x128xf32, #tpu.memory_space<vmem>>, vector<8x16xf32>,
    %c0_58 = arith.constant 0 : index
    %c32 = arith.constant 32 : index
    %60 = vector.load %arg14[%c0_58, %c32] : memref<8x128xf32, #tpu.memory_space<vmem>>, vector<8x16xf32>
    %c0_59 = arith.constant 0 : index
    %c32_60 = arith.constant 32 : index
    %61 = vector.load %arg15[%c0_59, %c32_60] : memref<8x128xf32, #tpu.memory_space<vmem>>, vector<8x16xf32>
    %c0_61 = arith.constant 0 : index
    %c32_62 = arith.constant 32 : index
    %62 = vector.load %arg16[%c0_61, %c32_62] : memref<8x128xf32, #tpu.memory_space<vmem>>, vector<8x16xf32>
    %cst_63 = arith.constant dense<0.000000e+00> : vector<8x8xf32>
    %63 = tpu.matmul %60, %61, %cst_63 {dimension_numbers = #tpu.dot_dimension_numbers<[1], [1], [0], [0], [0, 0, 1, 0], [], []>} : vector<8x16xf32>, vector<8x16xf32>, vector<8x8xf32> -> vector<8x8xf32>
    %cst_64 = arith.constant dense<0xFF800000> : vector<8xf32>
    %64 = vector.multi_reduction <maximumf>, %63, %cst_64 [1] : vector<8x8xf32> to vector<8xf32>
    %65 = vector.shape_cast %64 : vector<8xf32> to vector<8x1xf32>
    %66 = vector.broadcast %65 : vector<8x1xf32> to vector<8x8xf32>
    %67 = arith.subf %63, %66 : vector<8x8xf32>
    %68 = math.exp %67 : vector<8x8xf32>
    %cst_65 = arith.constant dense<0.000000e+00> : vector<8xf32>
    %69 = vector.multi_reduction <add>, %68, %cst_65 [1] : vector<8x8xf32> to vector<8xf32>
    %70 = vector.shape_cast %69 : vector<8xf32> to vector<8x1xf32>
    %71 = vector.broadcast %70 : vector<8x1xf32> to vector<8x8xf32>
    %72 = arith.divf %68, %71 : vector<8x8xf32>
    %c0_66 = arith.constant 0 : index
    %c2 = arith.constant 2 : index
    %c0_67 = arith.constant 0 : index
    %c0_68 = arith.constant 0 : index
    %73 = vector.load %arg13[%c0_66, %c2, %c0_67, %c0_68] : memref<1x8x8x8xf32, #tpu.memory_space<vmem>>, vector<1x1x8x8xf32>
    %74 = vector.shape_cast %73 : vector<1x1x8x8xf32> to vector<8x8xf32>
    %75 = vector.shape_cast %72 : vector<8x8xf32> to vector<1x1x8x8xf32>
    tpu.vector_store %arg13[%c0_66, %c2, %c0_67, %c0_68], %75 {strides = array<i32>} : memref<1x8x8x8xf32, #tpu.memory_space<vmem>>, vector<1x1x8x8xf32>,
    %cst_69 = arith.constant dense<0.000000e+00> : vector<8x16xf32>
    %76 = tpu.matmul %72, %62, %cst_69 {dimension_numbers = #tpu.dot_dimension_numbers<[1], [0], [0], [1], [0, 0, 1, 1], [], []>} : vector<8x8xf32>, vector<8x16xf32>, vector<8x16xf32> -> vector<8x16xf32>
    %c0_70 = arith.constant 0 : index
    %c32_71 = arith.constant 32 : index
    %77 = vector.load %arg17[%c0_70, %c32_71] : memref<8x128xf32, #tpu.memory_space<vmem>>, vector<8x16xf32>
    tpu.vector_store %arg17[%c0_70, %c32_71], %76 {strides = array<i32>} : memref<8x128xf32, #tpu.memory_space<vmem>>, vector<8x16xf32>,
    %c0_72 = arith.constant 0 : index
    %c48 = arith.constant 48 : index
    %78 = vector.load %arg14[%c0_72, %c48] : memref<8x128xf32, #tpu.memory_space<vmem>>, vector<8x16xf32>
    %c0_73 = arith.constant 0 : index
    %c48_74 = arith.constant 48 : index
    %79 = vector.load %arg15[%c0_73, %c48_74] : memref<8x128xf32, #tpu.memory_space<vmem>>, vector<8x16xf32>
    %c0_75 = arith.constant 0 : index
    %c48_76 = arith.constant 48 : index
    %80 = vector.load %arg16[%c0_75, %c48_76] : memref<8x128xf32, #tpu.memory_space<vmem>>, vector<8x16xf32>
    %cst_77 = arith.constant dense<0.000000e+00> : vector<8x8xf32>
    %81 = tpu.matmul %78, %79, %cst_77 {dimension_numbers = #tpu.dot_dimension_numbers<[1], [1], [0], [0], [0, 0, 1, 0], [], []>} : vector<8x16xf32>, vector<8x16xf32>, vector<8x8xf32> -> vector<8x8xf32>
    %cst_78 = arith.constant dense<0xFF800000> : vector<8xf32>
    %82 = vector.multi_reduction <maximumf>, %81, %cst_78 [1] : vector<8x8xf32> to vector<8xf32>
    %83 = vector.shape_cast %82 : vector<8xf32> to vector<8x1xf32>
    %84 = vector.broadcast %83 : vector<8x1xf32> to vector<8x8xf32>
    %85 = arith.subf %81, %84 : vector<8x8xf32>
    %86 = math.exp %85 : vector<8x8xf32>
    %cst_79 = arith.constant dense<0.000000e+00> : vector<8xf32>
    %87 = vector.multi_reduction <add>, %86, %cst_79 [1] : vector<8x8xf32> to vector<8xf32>
    %88 = vector.shape_cast %87 : vector<8xf32> to vector<8x1xf32>
    %89 = vector.broadcast %88 : vector<8x1xf32> to vector<8x8xf32>
    %90 = arith.divf %86, %89 : vector<8x8xf32>
    %c0_80 = arith.constant 0 : index
    %c3 = arith.constant 3 : index
    %c0_81 = arith.constant 0 : index
    %c0_82 = arith.constant 0 : index
    %91 = vector.load %arg13[%c0_80, %c3, %c0_81, %c0_82] : memref<1x8x8x8xf32, #tpu.memory_space<vmem>>, vector<1x1x8x8xf32>
    %92 = vector.shape_cast %91 : vector<1x1x8x8xf32> to vector<8x8xf32>
    %93 = vector.shape_cast %90 : vector<8x8xf32> to vector<1x1x8x8xf32>
    tpu.vector_store %arg13[%c0_80, %c3, %c0_81, %c0_82], %93 {strides = array<i32>} : memref<1x8x8x8xf32, #tpu.memory_space<vmem>>, vector<1x1x8x8xf32>,
    %cst_83 = arith.constant dense<0.000000e+00> : vector<8x16xf32>
    %94 = tpu.matmul %90, %80, %cst_83 {dimension_numbers = #tpu.dot_dimension_numbers<[1], [0], [0], [1], [0, 0, 1, 1], [], []>} : vector<8x8xf32>, vector<8x16xf32>, vector<8x16xf32> -> vector<8x16xf32>
    %c0_84 = arith.constant 0 : index
    %c48_85 = arith.constant 48 : index
    %95 = vector.load %arg17[%c0_84, %c48_85] : memref<8x128xf32, #tpu.memory_space<vmem>>, vector<8x16xf32>
    tpu.vector_store %arg17[%c0_84, %c48_85], %94 {strides = array<i32>} : memref<8x128xf32, #tpu.memory_space<vmem>>, vector<8x16xf32>,
    %c0_86 = arith.constant 0 : index
    %c64 = arith.constant 64 : index
    %96 = vector.load %arg14[%c0_86, %c64] : memref<8x128xf32, #tpu.memory_space<vmem>>, vector<8x16xf32>
    %c0_87 = arith.constant 0 : index
    %c64_88 = arith.constant 64 : index
    %97 = vector.load %arg15[%c0_87, %c64_88] : memref<8x128xf32, #tpu.memory_space<vmem>>, vector<8x16xf32>
    %c0_89 = arith.constant 0 : index
    %c64_90 = arith.constant 64 : index
    %98 = vector.load %arg16[%c0_89, %c64_90] : memref<8x128xf32, #tpu.memory_space<vmem>>, vector<8x16xf32>
    %cst_91 = arith.constant dense<0.000000e+00> : vector<8x8xf32>
    %99 = tpu.matmul %96, %97, %cst_91 {dimension_numbers = #tpu.dot_dimension_numbers<[1], [1], [0], [0], [0, 0, 1, 0], [], []>} : vector<8x16xf32>, vector<8x16xf32>, vector<8x8xf32> -> vector<8x8xf32>
    %cst_92 = arith.constant dense<0xFF800000> : vector<8xf32>
    %100 = vector.multi_reduction <maximumf>, %99, %cst_92 [1] : vector<8x8xf32> to vector<8xf32>
    %101 = vector.shape_cast %100 : vector<8xf32> to vector<8x1xf32>
    %102 = vector.broadcast %101 : vector<8x1xf32> to vector<8x8xf32>
    %103 = arith.subf %99, %102 : vector<8x8xf32>
    %104 = math.exp %103 : vector<8x8xf32>
    %cst_93 = arith.constant dense<0.000000e+00> : vector<8xf32>
    %105 = vector.multi_reduction <add>, %104, %cst_93 [1] : vector<8x8xf32> to vector<8xf32>
    %106 = vector.shape_cast %105 : vector<8xf32> to vector<8x1xf32>
    %107 = vector.broadcast %106 : vector<8x1xf32> to vector<8x8xf32>
    %108 = arith.divf %104, %107 : vector<8x8xf32>
    %c0_94 = arith.constant 0 : index
    %c4 = arith.constant 4 : index
    %c0_95 = arith.constant 0 : index
    %c0_96 = arith.constant 0 : index
    %109 = vector.load %arg13[%c0_94, %c4, %c0_95, %c0_96] : memref<1x8x8x8xf32, #tpu.memory_space<vmem>>, vector<1x1x8x8xf32>
    %110 = vector.shape_cast %109 : vector<1x1x8x8xf32> to vector<8x8xf32>
    %111 = vector.shape_cast %108 : vector<8x8xf32> to vector<1x1x8x8xf32>
    tpu.vector_store %arg13[%c0_94, %c4, %c0_95, %c0_96], %111 {strides = array<i32>} : memref<1x8x8x8xf32, #tpu.memory_space<vmem>>, vector<1x1x8x8xf32>,
    %cst_97 = arith.constant dense<0.000000e+00> : vector<8x16xf32>
    %112 = tpu.matmul %108, %98, %cst_97 {dimension_numbers = #tpu.dot_dimension_numbers<[1], [0], [0], [1], [0, 0, 1, 1], [], []>} : vector<8x8xf32>, vector<8x16xf32>, vector<8x16xf32> -> vector<8x16xf32>
    %c0_98 = arith.constant 0 : index
    %c64_99 = arith.constant 64 : index
    %113 = vector.load %arg17[%c0_98, %c64_99] : memref<8x128xf32, #tpu.memory_space<vmem>>, vector<8x16xf32>
    tpu.vector_store %arg17[%c0_98, %c64_99], %112 {strides = array<i32>} : memref<8x128xf32, #tpu.memory_space<vmem>>, vector<8x16xf32>,
    %c0_100 = arith.constant 0 : index
    %c80 = arith.constant 80 : index
    %114 = vector.load %arg14[%c0_100, %c80] : memref<8x128xf32, #tpu.memory_space<vmem>>, vector<8x16xf32>
    %c0_101 = arith.constant 0 : index
    %c80_102 = arith.constant 80 : index
    %115 = vector.load %arg15[%c0_101, %c80_102] : memref<8x128xf32, #tpu.memory_space<vmem>>, vector<8x16xf32>
    %c0_103 = arith.constant 0 : index
    %c80_104 = arith.constant 80 : index
    %116 = vector.load %arg16[%c0_103, %c80_104] : memref<8x128xf32, #tpu.memory_space<vmem>>, vector<8x16xf32>
    %cst_105 = arith.constant dense<0.000000e+00> : vector<8x8xf32>
    %117 = tpu.matmul %114, %115, %cst_105 {dimension_numbers = #tpu.dot_dimension_numbers<[1], [1], [0], [0], [0, 0, 1, 0], [], []>} : vector<8x16xf32>, vector<8x16xf32>, vector<8x8xf32> -> vector<8x8xf32>
    %cst_106 = arith.constant dense<0xFF800000> : vector<8xf32>
    %118 = vector.multi_reduction <maximumf>, %117, %cst_106 [1] : vector<8x8xf32> to vector<8xf32>
    %119 = vector.shape_cast %118 : vector<8xf32> to vector<8x1xf32>
    %120 = vector.broadcast %119 : vector<8x1xf32> to vector<8x8xf32>
    %121 = arith.subf %117, %120 : vector<8x8xf32>
    %122 = math.exp %121 : vector<8x8xf32>
    %cst_107 = arith.constant dense<0.000000e+00> : vector<8xf32>
    %123 = vector.multi_reduction <add>, %122, %cst_107 [1] : vector<8x8xf32> to vector<8xf32>
    %124 = vector.shape_cast %123 : vector<8xf32> to vector<8x1xf32>
    %125 = vector.broadcast %124 : vector<8x1xf32> to vector<8x8xf32>
    %126 = arith.divf %122, %125 : vector<8x8xf32>
    %c0_108 = arith.constant 0 : index
    %c5 = arith.constant 5 : index
    %c0_109 = arith.constant 0 : index
    %c0_110 = arith.constant 0 : index
    %127 = vector.load %arg13[%c0_108, %c5, %c0_109, %c0_110] : memref<1x8x8x8xf32, #tpu.memory_space<vmem>>, vector<1x1x8x8xf32>
    %128 = vector.shape_cast %127 : vector<1x1x8x8xf32> to vector<8x8xf32>
    %129 = vector.shape_cast %126 : vector<8x8xf32> to vector<1x1x8x8xf32>
    tpu.vector_store %arg13[%c0_108, %c5, %c0_109, %c0_110], %129 {strides = array<i32>} : memref<1x8x8x8xf32, #tpu.memory_space<vmem>>, vector<1x1x8x8xf32>,
    %cst_111 = arith.constant dense<0.000000e+00> : vector<8x16xf32>
    %130 = tpu.matmul %126, %116, %cst_111 {dimension_numbers = #tpu.dot_dimension_numbers<[1], [0], [0], [1], [0, 0, 1, 1], [], []>} : vector<8x8xf32>, vector<8x16xf32>, vector<8x16xf32> -> vector<8x16xf32>
    %c0_112 = arith.constant 0 : index
    %c80_113 = arith.constant 80 : index
    %131 = vector.load %arg17[%c0_112, %c80_113] : memref<8x128xf32, #tpu.memory_space<vmem>>, vector<8x16xf32>
    tpu.vector_store %arg17[%c0_112, %c80_113], %130 {strides = array<i32>} : memref<8x128xf32, #tpu.memory_space<vmem>>, vector<8x16xf32>,
    %c0_114 = arith.constant 0 : index
    %c96 = arith.constant 96 : index
    %132 = vector.load %arg14[%c0_114, %c96] : memref<8x128xf32, #tpu.memory_space<vmem>>, vector<8x16xf32>
    %c0_115 = arith.constant 0 : index
    %c96_116 = arith.constant 96 : index
    %133 = vector.load %arg15[%c0_115, %c96_116] : memref<8x128xf32, #tpu.memory_space<vmem>>, vector<8x16xf32>
    %c0_117 = arith.constant 0 : index
    %c96_118 = arith.constant 96 : index
    %134 = vector.load %arg16[%c0_117, %c96_118] : memref<8x128xf32, #tpu.memory_space<vmem>>, vector<8x16xf32>
    %cst_119 = arith.constant dense<0.000000e+00> : vector<8x8xf32>
    %135 = tpu.matmul %132, %133, %cst_119 {dimension_numbers = #tpu.dot_dimension_numbers<[1], [1], [0], [0], [0, 0, 1, 0], [], []>} : vector<8x16xf32>, vector<8x16xf32>, vector<8x8xf32> -> vector<8x8xf32>
    %cst_120 = arith.constant dense<0xFF800000> : vector<8xf32>
    %136 = vector.multi_reduction <maximumf>, %135, %cst_120 [1] : vector<8x8xf32> to vector<8xf32>
    %137 = vector.shape_cast %136 : vector<8xf32> to vector<8x1xf32>
    %138 = vector.broadcast %137 : vector<8x1xf32> to vector<8x8xf32>
    %139 = arith.subf %135, %138 : vector<8x8xf32>
    %140 = math.exp %139 : vector<8x8xf32>
    %cst_121 = arith.constant dense<0.000000e+00> : vector<8xf32>
    %141 = vector.multi_reduction <add>, %140, %cst_121 [1] : vector<8x8xf32> to vector<8xf32>
    %142 = vector.shape_cast %141 : vector<8xf32> to vector<8x1xf32>
    %143 = vector.broadcast %142 : vector<8x1xf32> to vector<8x8xf32>
    %144 = arith.divf %140, %143 : vector<8x8xf32>
    %c0_122 = arith.constant 0 : index
    %c6 = arith.constant 6 : index
    %c0_123 = arith.constant 0 : index
    %c0_124 = arith.constant 0 : index
    %145 = vector.load %arg13[%c0_122, %c6, %c0_123, %c0_124] : memref<1x8x8x8xf32, #tpu.memory_space<vmem>>, vector<1x1x8x8xf32>
    %146 = vector.shape_cast %145 : vector<1x1x8x8xf32> to vector<8x8xf32>
    %147 = vector.shape_cast %144 : vector<8x8xf32> to vector<1x1x8x8xf32>
    tpu.vector_store %arg13[%c0_122, %c6, %c0_123, %c0_124], %147 {strides = array<i32>} : memref<1x8x8x8xf32, #tpu.memory_space<vmem>>, vector<1x1x8x8xf32>,
    %cst_125 = arith.constant dense<0.000000e+00> : vector<8x16xf32>
    %148 = tpu.matmul %144, %134, %cst_125 {dimension_numbers = #tpu.dot_dimension_numbers<[1], [0], [0], [1], [0, 0, 1, 1], [], []>} : vector<8x8xf32>, vector<8x16xf32>, vector<8x16xf32> -> vector<8x16xf32>
    %c0_126 = arith.constant 0 : index
    %c96_127 = arith.constant 96 : index
    %149 = vector.load %arg17[%c0_126, %c96_127] : memref<8x128xf32, #tpu.memory_space<vmem>>, vector<8x16xf32>
    tpu.vector_store %arg17[%c0_126, %c96_127], %148 {strides = array<i32>} : memref<8x128xf32, #tpu.memory_space<vmem>>, vector<8x16xf32>,
    %c0_128 = arith.constant 0 : index
    %c112 = arith.constant 112 : index
    %150 = vector.load %arg14[%c0_128, %c112] : memref<8x128xf32, #tpu.memory_space<vmem>>, vector<8x16xf32>
    %c0_129 = arith.constant 0 : index
    %c112_130 = arith.constant 112 : index
    %151 = vector.load %arg15[%c0_129, %c112_130] : memref<8x128xf32, #tpu.memory_space<vmem>>, vector<8x16xf32>
    %c0_131 = arith.constant 0 : index
    %c112_132 = arith.constant 112 : index
    %152 = vector.load %arg16[%c0_131, %c112_132] : memref<8x128xf32, #tpu.memory_space<vmem>>, vector<8x16xf32>
    %cst_133 = arith.constant dense<0.000000e+00> : vector<8x8xf32>
    %153 = tpu.matmul %150, %151, %cst_133 {dimension_numbers = #tpu.dot_dimension_numbers<[1], [1], [0], [0], [0, 0, 1, 0], [], []>} : vector<8x16xf32>, vector<8x16xf32>, vector<8x8xf32> -> vector<8x8xf32>
    %cst_134 = arith.constant dense<0xFF800000> : vector<8xf32>
    %154 = vector.multi_reduction <maximumf>, %153, %cst_134 [1] : vector<8x8xf32> to vector<8xf32>
    %155 = vector.shape_cast %154 : vector<8xf32> to vector<8x1xf32>
    %156 = vector.broadcast %155 : vector<8x1xf32> to vector<8x8xf32>
    %157 = arith.subf %153, %156 : vector<8x8xf32>
    %158 = math.exp %157 : vector<8x8xf32>
    %cst_135 = arith.constant dense<0.000000e+00> : vector<8xf32>
    %159 = vector.multi_reduction <add>, %158, %cst_135 [1] : vector<8x8xf32> to vector<8xf32>
    %160 = vector.shape_cast %159 : vector<8xf32> to vector<8x1xf32>
    %161 = vector.broadcast %160 : vector<8x1xf32> to vector<8x8xf32>
    %162 = arith.divf %158, %161 : vector<8x8xf32>
    %c0_136 = arith.constant 0 : index
    %c7 = arith.constant 7 : index
    %c0_137 = arith.constant 0 : index
    %c0_138 = arith.constant 0 : index
    %163 = vector.load %arg13[%c0_136, %c7, %c0_137, %c0_138] : memref<1x8x8x8xf32, #tpu.memory_space<vmem>>, vector<1x1x8x8xf32>
    %164 = vector.shape_cast %163 : vector<1x1x8x8xf32> to vector<8x8xf32>
    %165 = vector.shape_cast %162 : vector<8x8xf32> to vector<1x1x8x8xf32>
    tpu.vector_store %arg13[%c0_136, %c7, %c0_137, %c0_138], %165 {strides = array<i32>} : memref<1x8x8x8xf32, #tpu.memory_space<vmem>>, vector<1x1x8x8xf32>,
    %cst_139 = arith.constant dense<0.000000e+00> : vector<8x16xf32>
    %166 = tpu.matmul %162, %152, %cst_139 {dimension_numbers = #tpu.dot_dimension_numbers<[1], [0], [0], [1], [0, 0, 1, 1], [], []>} : vector<8x8xf32>, vector<8x16xf32>, vector<8x16xf32> -> vector<8x16xf32>
    %c0_140 = arith.constant 0 : index
    %c112_141 = arith.constant 112 : index
    %167 = vector.load %arg17[%c0_140, %c112_141] : memref<8x128xf32, #tpu.memory_space<vmem>>, vector<8x16xf32>
    tpu.vector_store %arg17[%c0_140, %c112_141], %166 {strides = array<i32>} : memref<8x128xf32, #tpu.memory_space<vmem>>, vector<8x16xf32>,
    %c0_142 = arith.constant 0 : index
    %c0_143 = arith.constant 0 : index
    %168 = vector.load %arg17[%c0_142, %c0_143] : memref<8x128xf32, #tpu.memory_space<vmem>>, vector<8x128xf32>
    %c0_144 = arith.constant 0 : index
    %c0_145 = arith.constant 0 : index
    %169 = vector.load %arg10[%c0_144, %c0_145] : memref<128x128xf32, #tpu.memory_space<vmem>>, vector<128x128xf32>
    %cst_146 = arith.constant dense<0.000000e+00> : vector<8x128xf32>
    %170 = tpu.matmul %168, %169, %cst_146 {dimension_numbers = #tpu.dot_dimension_numbers<[1], [0], [0], [1], [0, 0, 1, 1], [], []>} : vector<8x128xf32>, vector<128x128xf32>, vector<8x128xf32> -> vector<8x128xf32>
    %c0_147 = arith.constant 0 : index
    %c0_148 = arith.constant 0 : index
    %171 = vector.load %arg11[%c0_147, %c0_148] : memref<1x128xf32, #tpu.memory_space<vmem>>, vector<1x128xf32>
    %172 = vector.broadcast %171 : vector<1x128xf32> to vector<8x128xf32>
    %173 = arith.addf %170, %172 : vector<8x128xf32>
    %c0_149 = arith.constant 0 : index
    %c0_150 = arith.constant 0 : index
    %c0_151 = arith.constant 0 : index
    %174 = vector.load %arg12[%c0_149, %c0_150, %c0_151] : memref<1x8x128xf32, #tpu.memory_space<vmem>>, vector<1x8x128xf32>
    %175 = vector.shape_cast %174 : vector<1x8x128xf32> to vector<8x128xf32>
    %176 = vector.shape_cast %173 : vector<8x128xf32> to vector<1x8x128xf32>
    tpu.vector_store %arg12[%c0_149, %c0_150, %c0_151], %176 {strides = array<i32>} : memref<1x8x128xf32, #tpu.memory_space<vmem>>, vector<1x8x128xf32>,
    return
  }
  func.func @transform_0(%arg0: i32) -> (i32, i32, i32) {
    %c0_i32 = arith.constant 0 : i32
    %c0_i32_0 = arith.constant 0 : i32
    %c0_i32_1 = arith.constant 0 : i32
    return %arg0, %c0_i32, %c0_i32_0 : i32, i32, i32
  }
  func.func @transform_1(%arg0: i32) -> (i32, i32, i32) {
    %c0_i32 = arith.constant 0 : i32
    %c0_i32_0 = arith.constant 0 : i32
    %c0_i32_1 = arith.constant 0 : i32
    return %arg0, %c0_i32, %c0_i32_0 : i32, i32, i32
  }
  func.func @transform_2(%arg0: i32) -> (i32, i32, i32) {
    %c0_i32 = arith.constant 0 : i32
    %c0_i32_0 = arith.constant 0 : i32
    %c0_i32_1 = arith.constant 0 : i32
    return %arg0, %c0_i32, %c0_i32_0 : i32, i32, i32
  }
  func.func @transform_3(%arg0: i32) -> (i32, i32) {
    %c0_i32 = arith.constant 0 : i32
    %c0_i32_0 = arith.constant 0 : i32
    %c0_i32_1 = arith.constant 0 : i32
    return %c0_i32, %c0_i32_0 : i32, i32
  }
  func.func @transform_4(%arg0: i32) -> (i32, i32) {
    %c0_i32 = arith.constant 0 : i32
    %c0_i32_0 = arith.constant 0 : i32
    %c0_i32_1 = arith.constant 0 : i32
    return %c0_i32, %c0_i32_0 : i32, i32
  }
  func.func @transform_5(%arg0: i32) -> (i32, i32) {
    %c0_i32 = arith.constant 0 : i32
    %c0_i32_0 = arith.constant 0 : i32
    %c0_i32_1 = arith.constant 0 : i32
    return %c0_i32, %c0_i32_0 : i32, i32
  }
  func.func @transform_6(%arg0: i32) -> (i32, i32) {
    %c0_i32 = arith.constant 0 : i32
    %c0_i32_0 = arith.constant 0 : i32
    %c0_i32_1 = arith.constant 0 : i32
    return %c0_i32, %c0_i32_0 : i32, i32
  }
  func.func @transform_7(%arg0: i32) -> (i32, i32) {
    %c0_i32 = arith.constant 0 : i32
    %c0_i32_0 = arith.constant 0 : i32
    %c0_i32_1 = arith.constant 0 : i32
    return %c0_i32, %c0_i32_0 : i32, i32
  }
  func.func @transform_8(%arg0: i32) -> (i32, i32) {
    %c0_i32 = arith.constant 0 : i32
    %c0_i32_0 = arith.constant 0 : i32
    %c0_i32_1 = arith.constant 0 : i32
    return %c0_i32, %c0_i32_0 : i32, i32
  }
  func.func @transform_9(%arg0: i32) -> (i32, i32) {
    %c0_i32 = arith.constant 0 : i32
    %c0_i32_0 = arith.constant 0 : i32
    %c0_i32_1 = arith.constant 0 : i32
    return %c0_i32, %c0_i32_0 : i32, i32
  }
  func.func @transform_10(%arg0: i32) -> (i32, i32) {
    %c0_i32 = arith.constant 0 : i32
    %c0_i32_0 = arith.constant 0 : i32
    %c0_i32_1 = arith.constant 0 : i32
    return %c0_i32, %c0_i32_0 : i32, i32
  }
  func.func @transform_11(%arg0: i32) -> (i32, i32, i32) {
    %c0_i32 = arith.constant 0 : i32
    %c0_i32_0 = arith.constant 0 : i32
    %c0_i32_1 = arith.constant 0 : i32
    return %arg0, %c0_i32, %c0_i32_0 : i32, i32, i32
  }
  func.func @transform_12(%arg0: i32) -> (i32, i32, i32, i32) {
    %c0_i32 = arith.constant 0 : i32
    %c0_i32_0 = arith.constant 0 : i32
    %c0_i32_1 = arith.constant 0 : i32
    %c0_i32_2 = arith.constant 0 : i32
    return %arg0, %c0_i32, %c0_i32_0, %c0_i32_1 : i32, i32, i32, i32
  }
}

</mosaic_0001>

<bundles_post_ra>
// kernel: attention_layer.1
= control target key start
LH: loop header
LB: loop body
LE: loop exit
PB: predicated region body
PF: predicated region fallthrough
CT: control target
= control target key end

     0   :  { %s2632_s0 = inlined_call_operand.hbm [shape: f32[2,8,128], index: 0, kind: input, shape index: {}]   ;;  %s2633_s1 = inlined_call_operand.hbm [shape: f32[2,8,128], index: 1, kind: input, shape index: {}]   ;;  %s2634_s2 = inlined_call_operand.hbm [shape: f32[2,8,128], index: 2, kind: input, shape index: {}]   ;;  %s2635_s3 = inlined_call_operand.vmem [shape: f32[128,128], index: 3, kind: input, shape index: {}]   ;;  %s2636_s4 = inlined_call_operand.vmem [shape: f32[128,128], index: 4, kind: input, shape index: {}]   ;;  %s2637_s5 = inlined_call_operand.vmem [shape: f32[128,128], index: 5, kind: input, shape index: {}]   ;;  %s2638_s6 = inlined_call_operand.vmem [shape: f32[1,128], index: 6, kind: input, shape index: {}]   ;;  %s2639_s7 = inlined_call_operand.vmem [shape: f32[1,128], index: 7, kind: input, shape index: {}]   ;;  %s2640_s8 = inlined_call_operand.vmem [shape: f32[1,128], index: 8, kind: input, shape index: {}]   ;;  %s2641_s9 = inlined_call_operand.hbm [shape: f32[128,128], index: 9, kind: input, shape index: {}]   ;;  %s2642_s10 = inlined_call_operand.vmem [shape: f32[1,128], index: 10, kind: input, shape index: {}]   ;;  %s2643_s11 = inlined_call_operand.hbm [shape: f32[2,8,128], index: 11, kind: output, shape index: {0}]   ;;  %s2644_s12 = inlined_call_operand.hbm [shape: f32[2,8,8,8], index: 12, kind: output, shape index: {1}]  }
   0x1   :  { %2655 = sst [smem:[#allocation28_spill]] %s2632_s0 }
   0x2   :  { %2656 = sst [smem:[#allocation29_spill]] %s2633_s1 }
   0x3   :  { %2657 = sst [smem:[#allocation30_spill]] %s2640_s8 }
   0x4   :  { %2658 = sst [smem:[#allocation31_spill]] %s2641_s9 }
   0x5   :  { %2659 = sst [smem:[#allocation32_spill]] %s2642_s10 }
   0x6   :  { %2660 = sst [smem:[#allocation33_spill]] %s2643_s11 }
   0x7   :  { %2661 = sst [smem:[#allocation34_spill]] %s2644_s12 }
   0x8   :  { %18 = vsyncpa [#allocation7], 0 }
   0x9   :  { %20 = vsyncpa [#allocation7 + $0x1], 0 }
   0xa   :  { %21 = vsyncpa [#allocation10], 0 }
   0xb   :  { %23 = vsyncpa [#allocation10 + $0x1], 0 }
   0xc   :  { %24 = vsyncpa [#allocation13], 0 }
   0xd   :  { %25 = vsyncpa [#allocation8], 0 }
   0xe   :  { %27 = vsyncpa [#allocation8 + $0x1], 0 }
   0xf   :  { %28 = vsyncpa [#allocation16], 0 }
  0x10   :  { %30 = vsyncpa [#allocation16 + $0x1], 0  ;;  %s2100_s21 = smov 0   ;;  %s2102_s22 = smov 0  }
  0x11   :  { %s2104_s23 = smov 0   ;;  %s2106_s24 = smov 0  }
  0x12 LB: > { %2662 = sst [smem:[#allocation22_spill]] %s2009_s21  ;;  %s2121_s25 = sadd.s32 4294967295, %s2021_s24   ;;  %s2021_s24 = sphi %s2106_s24, %s2688_s24   ;;  %s2017_s23 = sphi %s2104_s23, %s2692_s23   ;;  %s2013_s22 = sphi %s2102_s22, %s2691_s22   ;;  %s2009_s21 = sphi %s2100_s21, %s2690_s21  }
  0x13   : > { %2663 = sst [smem:[#allocation23_spill]] %s2021_s24  ;;  %s1620_s26 = sadd.s32 4294967294, %s2021_s24  }
  0x14   : > { %s2125_s27 = sadd.s32 1, %s2021_s24   ;;  %s43_s28 = sadd.s32 1, %s2017_s23 }
  0x15   : > { %2664 = sst [smem:[#allocation24_spill]] %s2125_s27  ;;  %s40_s29 = ssub.s32 %s2021_s24, %s2125_s27 }
  0x16   : > { %p50_p0 = scmp.ne.s32.totalorder %s2017_s23, %s2013_s22  ;;  %p41_p1 = scmp.eq.s32.totalorder %s40_s29, 0 }
  0x17   : > { %p51_p2 = scmp.eq.s32.totalorder %s2021_s24, 0  ;;  %p56_p3 = scmp.ne.s32.totalorder %s2013_s22, %s2009_s21 }
  0x18   : > { %p300_p4 = scmp.eq.s32.totalorder %s2121_s25, 1  ;;  %p306_p7 = scmp.eq.s32.totalorder %s1620_s26, 1 }
  0x19   : > { %s2137_s30 = scalar_select %p41_p1, %s2017_s23, %s43_s28  }
  0x1a   : > { %p52_p5 = por %p51_p2, %p50_p0  ;;  %p2139_p6 = por %p300_p4, %p50_p0 }
  0x1b   : > { %2665 = sst [smem:[#allocation25_spill]] %s2137_s30  ;;  %p1712_p9 = scmp.lt.s32.totalorder %s2021_s24, 2 }
  0x1c   : > { %s2666_s13 = scalar_select %p2139_p6, 1, 0 }
  0x1d   : > { %p2148_p10 = por %p306_p7, %p56_p3  ;;  %s2647_s15 = sand.u32 1, %s2017_s23  }
  0x1e   : > { %2667 = sst [smem:[#allocation26_spill]] %s2666_s13  ;;  %s2155_s16 = sshll.u32 %s2647_s15, 3 }
  0x1f   : > { %s2668_s14 = scalar_select %p2148_p10, 1, 0 }
  0x20   : > { %s2158_s17 = sshll.u32 %s2021_s24, 3  ;;  %p2160_p11 = pnand %p1712_p9, %p52_p5 }
  0x21   : > { %2669 = sst [smem:[#allocation27_spill]] %s2668_s14  ;;  %s406_s19 = sand.u32 1, %s2021_s24  }
  0x22   : > { %s2671_s1 = sld [smem:[#allocation29_spill]]  ;;  %s410_s30 = scalar_lea.vmem [#allocation9], %s2155_s16 }
  0x23   : > { %s418_s27 = sshll.u32 %s410_s30, 4  ;;  %s2170_s15 = scalar_lea.sflag [#allocation10], %s406_s19  ;;  %s419_s27 = int_to_ptr.vmem [resolvable:$true] %s418_s27 }
  0x24   : > { %p1799_p13 = pneg %p2160_p11 }
  0x28   : > { %s414_s28 = scalar_lea.hbm %s2671_s1, %s2158_s17  ;;  %s1802_s26 = scalar_lea.hbm %s2671_s1, 16 }
  0x29   : > { %s416_s29 = sshll.u32 %s414_s28, 4  ;;  %s417_s29 = int_to_ptr.hbm [resolvable:$true] %s416_s29 }
  0x2a   : > { %s1795_s14 = sshra.s32 %s417_s29, 4  ;;  %s1796_s14 = int_to_ptr.hbm [resolvable:$true] %s1795_s14 }
  0x2b   : > { %s1797_s10 = scalar_lea.hbm %s1796_s14, 8  ;;  %p1803_p2 = scmp.lt.s32.totalorder %s1796_s14, %s2671_s1 }
  0x2c   : > { %p1798_p12 = scmp.ne.s32.totalorder %s1796_s14, %s1797_s10  ;;  %p1804_p4 = scmp.lt.s32.totalorder %s1802_s26, %s1797_s10 }
  0x2e   : > { %p1800_p0 = pnand %p1799_p13, %p1798_p12  ;;  %p1805_p5 = por %p1804_p4, %p1803_p2 }
  0x30   : > { %p1801_p1 = pneg %p1800_p0 }
  0x32   : > { %p1806_p7 = pnand %p1805_p5, %p1801_p1 }
  0x34   : > { %1809 = shalt.err (!%p1806_p7)
}
  0x35   : > { %1700 = dma.hbm_to_vmem [thread:$0]  (!%p2160_p11), %s417_s29, 128, %s419_s27, %s2170_s15  }
  0x36   : > { %p57_p9 = scmp.eq.s32.totalorder %s2121_s25, 0  ;;  %p1621_p12 = scmp.ge.s32.totalorder %s2021_s24, 1 }
  0x37   : > { %p339_p0 = scmp.lt.s32.totalorder %s2021_s24, 3  ;;  %s2672_s9 = sld [smem:[#allocation31_spill]] }
  0x38   : > { %p2197_p1 = por %p57_p9, %p56_p3  ;;  %s2023_s27 = smov [#allocation12]  }
  0x39   : > { %p2201_p2 = pnand %p1621_p12, %p339_p0  ;;  %s370_s29 = sshll.u32 %s2023_s27, 4  ;;  %s371_s29 = int_to_ptr.vmem [resolvable:$true] %s370_s29 }
  0x3a   : > { %s2675_s0 = sld [smem:[#allocation28_spill]]  ;;  %s391_s10 = scalar_lea.vmem [#allocation6], %s2155_s16 }
  0x3b   : > { %p1690_p4 = pneg %p2201_p2  ;;  %s399_s11 = sshll.u32 %s391_s10, 4  ;;  %s400_s11 = int_to_ptr.vmem [resolvable:$true] %s399_s11 }
  0x3c   : > { %s2025_s24 = smov 8   ;;  %s2676_s21 = sand.u32 1, %s2017_s23  }
  0x3d   : > { %s368_s14 = sshll.u32 %s2672_s9, 4  ;;  %p1691_p5 = pnand %p1690_p4, %p57_p9  ;;  %s369_s14 = int_to_ptr.hbm [resolvable:$true] %s368_s14 }
  0x3e   : > { %s2024_s9 = smov 128   ;;  %s388_s27 = scalar_lea.sflag [#allocation7], %s2676_s21 }
  0x3f   : > { %1693 = dma.hbm_to_vmem [thread:$0]  (!%p1691_p5), %s369_s14, 2048, %s371_s29, [#allocation13], %s2024_s9, %s2024_s9, %s2025_s24  }
  0x40   : > { %s395_s30 = scalar_lea.hbm %s2675_s0, %s2158_s17  ;;  %s1862_s10 = scalar_lea.hbm %s2675_s0, 16 }
  0x41   : > { %s397_s1 = sshll.u32 %s395_s30, 4  ;;  %s398_s1 = int_to_ptr.hbm [resolvable:$true] %s397_s1 }
  0x42   : > { %s1855_s12 = sshra.s32 %s398_s1, 4  ;;  %s1856_s12 = int_to_ptr.hbm [resolvable:$true] %s1855_s12 }
  0x43   : > { %s1857_s13 = scalar_lea.hbm %s1856_s12, 8  ;;  %p1863_p0 = scmp.lt.s32.totalorder %s1856_s12, %s2675_s0 }
  0x44   : > { %p1858_p3 = scmp.ne.s32.totalorder %s1856_s12, %s1857_s13  ;;  %p1864_p4 = scmp.lt.s32.totalorder %s1862_s10, %s1857_s13 }
  0x46   : > { %p1860_p7 = pnand %p1858_p3, %p1799_p13  ;;  %p1865_p5 = por %p1864_p4, %p1863_p0 }
  0x48   : > { %p1861_p12 = pneg %p1860_p7 }
  0x4a   : > { %p1866_p8 = pnand %p1865_p5, %p1861_p12 }
  0x4c   : > { %1869 = shalt.err (!%p1866_p8)
}
  0x4d   : > { %1697 = dma.hbm_to_vmem [thread:$0]  (!%p2160_p11), %s398_s1, 128, %s400_s11, %s388_s27  }
  0x4e   : > { %s433_s24 = scalar_lea.hbm %s2634_s2, %s2158_s17  ;;  %s429_s29 = scalar_lea.vmem [#allocation11], %s2155_s16 }
  0x4f   : > { %s435_s14 = sshll.u32 %s433_s24, 4  ;;  %s437_s26 = sshll.u32 %s429_s29, 4  ;;  %s436_s14 = int_to_ptr.hbm [resolvable:$true] %s435_s14  ;;  %s438_s26 = int_to_ptr.vmem [resolvable:$true] %s437_s26 }
  0x50   : > { %s1885_s8 = sshra.s32 %s436_s14, 4  ;;  %s1892_s1 = scalar_lea.hbm %s2634_s2, 16  ;;  %s1886_s8 = int_to_ptr.hbm [resolvable:$true] %s1885_s8 }
  0x51   : > { %s1887_s12 = scalar_lea.hbm %s1886_s8, 8  ;;  %p1893_p12 = scmp.lt.s32.totalorder %s1886_s8, %s2634_s2 }
  0x52   : > { %p1888_p3 = scmp.ne.s32.totalorder %s1886_s8, %s1887_s12  ;;  %p1894_p0 = scmp.lt.s32.totalorder %s1892_s1, %s1887_s12 }
  0x54   : > { %p1890_p8 = pnand %p1888_p3, %p1799_p13  ;;  %p1895_p4 = por %p1894_p0, %p1893_p12 }
  0x56   : > { %p1891_p7 = pneg %p1890_p8 }
  0x58   : > { %p1896_p5 = pnand %p1895_p4, %p1891_p7 }
  0x5a   : > { %1899 = shalt.err (!%p1896_p5)
}
  0x5b   : > { %1703 = dma.hbm_to_vmem [thread:$0]  (!%p2160_p11), %s436_s14, 128, %s438_s26, %s2170_s15  }
  0x5c   : > { %446 = sbr.rel (%p2201_p2) target bundleno = 1586 (0x632), region = 64  ;;  %s2247_s16 = sand.u32 (!%p2201_p2), 1, %s2013_s22  }
  0x5d   : > { %s2250_s17 = sshll.u32 (!%p2201_p2), %s2247_s16, 3  ;;  %s449_s10 = scalar_lea.sflag (!%p2201_p2), [#allocation7], %s2247_s16 }
  0x5e   : > { %s452_s30 = scalar_lea.vmem (!%p2201_p2), [#allocation6], %s2250_s17 }
  0x61   : > { %1988 = dma.done.wait (%p2197_p1), %s449_s10, 128  }
  0x62   : > { %1990 = vsyncadd (%p2197_p1), %s449_s10, 4294967168  ;;  %s458_s15 = sand.u32 1, %s2121_s25   ;;  %s462_s20 = scalar_lea.vmem [#allocation9], %s2250_s17 }
  0x63   : > { %s459_s18 = scalar_lea.sflag [#allocation10], %s458_s15 }
  0x64   : > { %1992 = dma.done.wait (%p2197_p1), %s459_s18, 256  }
  0x65   : > { %1994 = vsyncadd (%p2197_p1), %s459_s18, 4294967040  ;;  %s472_s9 = scalar_lea.vmem [#allocation11], %s2250_s17 }
  0x66   : > { %1996 = dma.done.wait (%p57_p9), [#allocation13], 2048  }
  0x67   : > { %1998 = vsyncadd (%p57_p9), [#allocation13], 4294965248  ;;  %v593_v0 = vld [vmem:[%s2636_s4 + $0x78] sm:$0xff]  ;;  %v592_v2 = vld [vmem:[%s2636_s4 + $0x70] sm:$0xff]  ;;  %vm663_vm0 = vcmask 130048   ;;  %s2677_s26 = sld [smem:[#allocation30_spill]] }
  0x68   : > { %v634_v1 = vld [vmem:[%s2637_s5 + $0x78] sm:$0xff]  ;;  %598 = vmatpush.msra.mxu1 %v593_v0  ;;  %v633_v3 = vld [vmem:[%s2637_s5 + $0x70] sm:$0xff]  ;;  %v591_v5 = vld [vmem:[%s2636_s4 + $0x68] sm:$0xff]  ;;  %s2027_s8 = smov 96   ;;  %s2028_s19 = smov 80   ;;  %vm690_vm1 = vcmask 64512  }
  0x69   : > { %639 = vmatpush.msra.mxu2 %v634_v1  ;;  %v552_v4 = vld [vmem:[%s2635_s3 + $0x78] sm:$0xff]  ;;  %v632_v6 = vld [vmem:[%s2637_s5 + $0x68] sm:$0xff]  ;;  %v551_v7 = vld [vmem:[%s2635_s3 + $0x70] sm:$0xff]  ;;  %s2029_s12 = smov 64   ;;  %s2030_s13 = smov 48  }
  0x6a   : > { %557 = vmatpush.msra.mxu0 %v552_v4  ;;  %599 = vmatpush.msra.mxu1 %v592_v2  ;;  %v550_v8 = vld [vmem:[%s2635_s3 + $0x68] sm:$0xff]  ;;  %v590_v9 = vld [vmem:[%s2636_s4 + $0x60] sm:$0xff]  ;;  %v589_v12 = vld [vmem:[%s2636_s4 + $0x58] sm:$0xff]  ;;  %s2031_s28 = smov 32   ;;  %s2032_s1 = smov 16  }
  0x6b   : > { %640 = vmatpush.msra.mxu2 %v633_v3  ;;  %v631_v10 = vld [vmem:[%s2637_s5 + $0x60] sm:$0xff]  ;;  %v630_v13 = vld [vmem:[%s2637_s5 + $0x58] sm:$0xff]  ;;  %v588_v15 = vld [vmem:[%s2636_s4 + $0x50] sm:$0xff]  ;;  %s1636_s11 = sshll.u32 %s2247_s16, 6  ;;  %s1675_s15 = sshll.u32 %s2121_s25, 6 }
  0x6c   : > { %558 = vmatpush.msra.mxu0 %v551_v7  ;;  %600 = vmatpush.msra.mxu1 %v591_v5  ;;  %v549_v11 = vld [vmem:[%s2635_s3 + $0x60] sm:$0xff]  ;;  %v548_v14 = vld [vmem:[%s2635_s3 + $0x58] sm:$0xff]  ;;  %v629_v16 = vld [vmem:[%s2637_s5 + $0x50] sm:$0xff]  ;;  %s2481_s27 = scalar_lea.vmem [#allocation15], %s1636_s11  ;;  %s2679_s24 = sld [smem:[#allocation34_spill]] }
  0x6d   : > { %641 = vmatpush.msra.mxu2 %v632_v6  ;;  %v547_v17 = vld [vmem:[%s2635_s3 + $0x50] sm:$0xff]  ;;  %v587_v18 = vld [vmem:[%s2636_s4 + $0x48] sm:$0xff]  ;;  %v586_v21 = vld [vmem:[%s2636_s4 + $0x40] sm:$0xff]  ;;  %s1432_s29 = scalar_lea.sflag [#allocation16], %s2247_s16 }
  0x6e   : > { %559 = vmatpush.msra.mxu0 %v550_v8  ;;  %601 = vmatpush.msra.mxu1 %v590_v9  ;;  %v628_v19 = vld [vmem:[%s2637_s5 + $0x48] sm:$0xff]  ;;  %v627_v22 = vld [vmem:[%s2637_s5 + $0x40] sm:$0xff]  ;;  %v585_v24 = vld [vmem:[%s2636_s4 + $0x38] sm:$0xff] }
  0x6f   : > { %642 = vmatpush.msra.mxu2 %v631_v10  ;;  %v546_v20 = vld [vmem:[%s2635_s3 + $0x48] sm:$0xff]  ;;  %v545_v23 = vld [vmem:[%s2635_s3 + $0x40] sm:$0xff]  ;;  %v626_v25 = vld [vmem:[%s2637_s5 + $0x38] sm:$0xff] }
  0x70   : > { %560 = vmatpush.msra.mxu0 %v549_v11  ;;  %602 = vmatpush.msra.mxu1 %v589_v12  ;;  %v544_v26 = vld [vmem:[%s2635_s3 + $0x38] sm:$0xff]  ;;  %v584_v27 = vld [vmem:[%s2636_s4 + $0x30] sm:$0xff]  ;;  %v583_v29 = vld [vmem:[%s2636_s4 + $0x28] sm:$0xff] }
  0x71   : > { %643 = vmatpush.msra.mxu2 %v630_v13  ;;  %v625_v28 = vld [vmem:[%s2637_s5 + $0x30] sm:$0xff]  ;;  %v624_v31 = vld [vmem:[%s2637_s5 + $0x28] sm:$0xff]  ;;  %v582_v33 = vld [vmem:[%s2636_s4 + $0x20] sm:$0xff] }
  0x72   : > { %561 = vmatpush.msra.mxu0 %v548_v14  ;;  %603 = vmatpush.msra.mxu1 %v588_v15  ;;  %v543_v30 = vld [vmem:[%s2635_s3 + $0x30] sm:$0xff]  ;;  %v542_v32 = vld [vmem:[%s2635_s3 + $0x28] sm:$0xff]  ;;  %v623_v34 = vld [vmem:[%s2637_s5 + $0x20] sm:$0xff]  ;;  %s1457_s14 = scalar_lea.hbm %s2679_s24, %s1675_s15 }
  0x73   : > { %644 = vmatpush.msra.mxu2 %v629_v16  ;;  %v541_v35 = vld [vmem:[%s2635_s3 + $0x20] sm:$0xff]  ;;  %v581_v36 = vld [vmem:[%s2636_s4 + $0x18] sm:$0xff]  ;;  %v580_v39 = vld [vmem:[%s2636_s4 + $0x10] sm:$0xff] }
  0x74   : > { %562 = vmatpush.msra.mxu0 %v547_v17  ;;  %604 = vmatpush.msra.mxu1 %v587_v18  ;;  %v622_v37 = vld [vmem:[%s2637_s5 + $0x18] sm:$0xff]  ;;  %v621_v40 = vld [vmem:[%s2637_s5 + $0x10] sm:$0xff]  ;;  %v579_v42 = vld [vmem:[%s2636_s4 + $0x8] sm:$0xff] }
  0x75   : > { %645 = vmatpush.msra.mxu2 %v628_v19  ;;  %v540_v38 = vld [vmem:[%s2635_s3 + $0x18] sm:$0xff]  ;;  %v539_v41 = vld [vmem:[%s2635_s3 + $0x10] sm:$0xff]  ;;  %v620_v43 = vld [vmem:[%s2637_s5 + $0x8] sm:$0xff] }
  0x76   : > { %563 = vmatpush.msra.mxu0 %v546_v20  ;;  %605 = vmatpush.msra.mxu1 %v586_v21  ;;  %v538_v44 = vld [vmem:[%s2635_s3 + $0x8] sm:$0xff]  ;;  %v578_v45 = vld [vmem:[%s2636_s4] sm:$0xff] }
  0x77   : > { %646 = vmatpush.msra.mxu2 %v627_v22  ;;  %v619_v46 = vld [vmem:[%s2637_s5] sm:$0xff]  ;;  %v536_v48 = vld [vmem:[%s472_s9] sm:$0xff]  ;;  %s2026_s9 = smov 112  }
  0x78   : > { %564 = vmatpush.msra.mxu0 %v545_v23  ;;  %606 = vmatpush.msra.mxu1 %v585_v24  ;;  %v535_v47 = vld [vmem:[%s462_s20] sm:$0xff]  ;;  %v534_v50 = vld [vmem:[%s452_s30] sm:$0xff]  ;;  %s2680_s20 = smov %s2679_s24  ;;  %s1460_s30 = sshll.u32 %s1457_s14, 4  ;;  %s1461_s30 = int_to_ptr.hbm [resolvable:$true] %s1460_s30 }
  0x79   : > { %647 = vmatpush.msra.mxu2 %v626_v25  ;;  %v537_v49 = vld [vmem:[%s2635_s3] sm:$0xff] }
  0x7a   : > { %565 = vmatpush.msra.mxu0 %v544_v26  ;;  %607 = vmatpush.msra.mxu1 %v584_v27  ;;  %v1759_v51 = vld [vmem:[%s2639_s7] ss:$0 sm:$0xff] }
  0x7b   : > { %648 = vmatpush.msra.mxu2 %v625_v28  ;;  %v1760_v52 = vld [vmem:[%s2638_s6] ss:$0 sm:$0xff] }
  0x7c   : > { %566 = vmatpush.msra.mxu0 %v543_v30  ;;  %608 = vmatpush.msra.mxu1 %v583_v29  ;;  %v1761_v57 = vld [vmem:[%s2677_s26] ss:$0 sm:$0xff]  ;;  %s1929_s26 = sshra.s32 %s1461_s30, 4  ;;  %s1930_s26 = int_to_ptr.hbm [resolvable:$true] %s1929_s26 }
  0x7d   : > { %649 = vmatpush.msra.mxu2 %v624_v31  ;;  %p1936_p1 = scmp.lt.s32.totalorder %s1930_s26, %s2680_s20 }
  0x7e   : > { %567 = vmatpush.msra.mxu0 %v542_v32  ;;  %609 = vmatpush.msra.mxu1 %v582_v33 }
  0x7f   : > { %650 = vmatpush.msra.mxu2 %v623_v34 }
  0x80   : > { %568 = vmatpush.msra.mxu0 %v541_v35  ;;  %610 = vmatpush.msra.mxu1 %v581_v36 }
  0x81   : > { %651 = vmatpush.msra.mxu2 %v622_v37 }
  0x82   : > { %569 = vmatpush.msra.mxu0 %v540_v38  ;;  %611 = vmatpush.msra.mxu1 %v580_v39 }
  0x83   : > { %652 = vmatpush.msra.mxu2 %v621_v40 }
  0x84   : > { %570 = vmatpush.msra.mxu0 %v539_v41  ;;  %612 = vmatpush.msra.mxu1 %v579_v42 }
  0x85   : > { %653 = vmatpush.msra.mxu2 %v620_v43 }
  0x86   : > { %571 = vmatpush.msra.mxu0 %v538_v44  ;;  %613 = vmatpush.msra.mxu1 %v578_v45 }
  0x87   : > { %654 = vmatpush.msra.mxu2 %v619_v46  ;;  %614 = vmatmul.f32.vlgmr.msra.gmra.mxu1 %v535_v47 }
  0x88   : > { %655 = vmatmul.f32.vlgmr.msra.gmra.mxu2 %v536_v48  ;;  %572 = vmatpush.msra.mxu0 %v537_v49 }
  0x89   : > { %573 = vmatmul.f32.vlgmr.msra.gmra.mxu0 %v534_v50 }
 0x104   : > { %v615_v53 = vpop.f32.mrf.mxu1 }
 0x105   : > { %v616_v54 = vadd.f32 %v1759_v51, %v615_v53 }
 0x106   : > { %v574_v55 = vpop.f32.mrf.mxu0 }
 0x107   : > { %747 = vrot.lane.b32.xlu0 %v616_v54, %s2026_s9  ;;  %v2426_v56 = vadd.f32 %v1760_v52, %v574_v55  ;;  %1637 = vmatpush.xpose.msk.msrb.mxu0 %vm663_vm0, %v616_v54 }
 0x10a   : > { %1638 = vmatmul.msk.f32.vlgmr.msrb.gmra.mxu0 %vm663_vm0, %v2426_v56 }
 0x10b   : > { %v656_v58 = vpop.f32.mrf.mxu2 }
 0x10c   : > { %v2434_v59 = vadd.f32 %v1761_v57, %v656_v58 }
 0x10e   : > { %800 = vrot.lane.b32.xlu2 %v2434_v59, %s2026_s9  ;;  %734 = vmatpush.msrb.mxu2 %v2434_v59 }
 0x10f   : > { %744 = vrot.lane.b32.xlu0 %v2426_v56, %s2026_s9 }
 0x116   : > { %839 = vrot.lane.b32.xlu2 %v616_v54, %s2027_s8 }
 0x117   : > { %931 = vrot.lane.b32.xlu0 %v616_v54, %s2028_s19 }
 0x11e   : > { %928 = vrot.lane.b32.xlu2 %v2426_v56, %s2028_s19 }
 0x11f   : > { %1023 = vrot.lane.b32.xlu0 %v616_v54, %s2029_s12 }
 0x126   : > { %1115 = vrot.lane.b32.xlu2 %v616_v54, %s2030_s13 }
 0x127   : > { %1020 = vrot.lane.b32.xlu0 %v2426_v56, %s2029_s12 }
 0x12e   : > { %1112 = vrot.lane.b32.xlu2 %v2426_v56, %s2030_s13 }
 0x12f   : > { %1207 = vrot.lane.b32.xlu0 %v616_v54, %s2031_s28 }
 0x136   : > { %1299 = vrot.lane.b32.xlu2 %v616_v54, %s2032_s1 }
 0x137   : > { %1296 = vrot.lane.b32.xlu0 %v2426_v56, %s2032_s1 }
 0x168   : > { %v801_v60 = vpop.permute.xlu2 %800 }
 0x169   : > { %821 = vmatpush.msra.mxu3 %v801_v60 }
 0x170   : > { %v840_v61 = vpop.permute.xlu2 %839 }
 0x171   : > { %1644 = vmatpush.xpose.msk.msrb.mxu3 %vm663_vm0, %v840_v61 }
 0x178   : > { %v929_v62 = vpop.permute.xlu2 %928 }
 0x179   : > { %v748_v63 = vpop.permute.xlu0 %747 }
 0x17a   : > { %1640 = vmatpush.xpose.msk.msrb.mxu1 %vm663_vm0, %v748_v63 }
 0x180   : > { %v1116_v0 = vpop.permute.xlu2 %1115 }
 0x181   : > { %v745_v1 = vpop.permute.xlu0 %744 }
 0x182   : > { %1641 = vmatmul.msk.f32.vlgmr.msrb.gmra.mxu1 %vm663_vm0, %v745_v1 }
 0x187   : > { %v2458_v3 = vpop.f32.mrf.mxu0 }
 0x188   : > { %v1113_v2 = vpop.permute.xlu2 %1112  ;;  %v691_v4 = vsel %vm690_vm1, %v2458_v3, -inf }
 0x189   : > { %v932_v5 = vpop.permute.xlu0 %931  ;;  %692 = vmax.xlane.f32.xlu2 %v691_v4 }
 0x18a   : > { %1648 = vmatpush.xpose.msk.msra.mxu1 %vm663_vm0, %v932_v5 }
 0x18d   : > { %1649 = vmatmul.msk.f32.vlgmr.msra.gmra.mxu1 %vm663_vm0, %v929_v62 }
 0x18e   : > { %1656 = vmatpush.xpose.msk.msrb.mxu1 %vm663_vm0, %v1116_v0 }
 0x190   : > { %v1300_v6 = vpop.permute.xlu2 %1299 }
 0x191   : > { %v1024_v7 = vpop.permute.xlu0 %1023 }
 0x192   : > { %1664 = vmatpush.xpose.msk.msra.mxu1 %vm663_vm0, %v1300_v6 }
 0x195   : > { %1657 = vmatmul.msk.f32.vlgmr.msrb.gmra.mxu1 %vm663_vm0, %v1113_v2 }
 0x199   : > { %v1021_v8 = vpop.permute.xlu0 %1020 }
 0x1a1   : > { %v1208_v9 = vpop.permute.xlu0 %1207 }
 0x1a9   : > { %v1297_v10 = vpop.permute.xlu0 %1296 }
 0x1aa   : > { %1665 = vmatmul.msk.f32.vlgmr.msra.gmra.mxu1 %vm663_vm0, %v1297_v10 }
 0x1fc   : > { %v693_v43 = vpop.xlane.xlu2 %692 }
 0x1fd   : > { %v694_v49 = vsub.f32 %v2458_v3, %v693_v43 }
 0x1ff   : > { %v770_v11 = vpop.f32.mrf.mxu1  ;;  %v695_v52 = vmul.f32 1.442695, %v694_v49 }
 0x200   : > { %v773_v12 = vsel %vm690_vm1, %v770_v11, -inf }
 0x201   : > { %774 = vmax.xlane.f32.xlu1 %v773_v12 }
 0x20a   : > { %v954_v13 = vpop.f32.mrf.mxu1 }
 0x20b   : > { %v957_v23 = vsel %vm690_vm1, %v954_v13, -inf }
 0x212   : > { %v2469_v14 = vpop.f32.mrf.mxu1 }
 0x213   : > { %v1141_v15 = vsel %vm690_vm1, %v2469_v14, -inf }
 0x214   : > { %1142 = vmax.xlane.f32.xlu2 %v1141_v15 }
 0x227   : > { %v1322_v16 = vpop.f32.mrf.mxu1 }
 0x228   : > { %v1325_v17 = vsel %vm690_vm1, %v1322_v16, -inf }
 0x229   : > { %1326 = vmax.xlane.f32.xlu2 %v1325_v17 }
 0x274   : > { %v775_v18 = vpop.xlane.xlu1 %774 }
 0x275   : > { %v776_v19 = vsub.f32 %v770_v11, %v775_v18 }
 0x277   : > { %v777_v20 = vmul.f32 1.442695, %v776_v19 }
 0x279   : > { %1763 = vpow2.f32 %v777_v20 }
 0x27f   : > { %v1764_v21 = vpop.eup %1763 }
 0x280   : > { %v779_v22 = vsel %vm690_vm1, %v1764_v21, 0.0 }
 0x281   : > { %780 = vadd.xlane.f32.xlu1 %v779_v22 }
 0x287   : > { %v1143_v44 = vpop.xlane.xlu2 %1142 }
 0x288   : > { %v1144_v54 = vsub.f32 %v2469_v14, %v1143_v44 }
 0x28a   : > { %v1145_v58 = vmul.f32 1.442695, %v1144_v54 }
 0x29a   : > { %836 = vrot.lane.b32.xlu1 %v2426_v56, %s2027_s8 }
 0x29c   : > { %v1327_v45 = vpop.xlane.xlu2 %1326 }
 0x29d   : > { %v1328_v46 = vsub.f32 %v1322_v16, %v1327_v45 }
 0x29f   : > { %v1329_v48 = vmul.f32 1.442695, %v1328_v46 }
 0x2a2   : > { %1204 = vrot.lane.b32.xlu1 %v2426_v56, %s2031_s28 }
 0x2cc   : > { %958 = vmax.xlane.f32.xlu1 %v957_v23 }
 0x2f4   : > { %v781_v24 = vpop.xlane.xlu1 %780 }
 0x2f5   : > { %1765 = vrcp.f32 %v781_v24  ;;  %v793_v28 = vand.u32 2147483648, %v781_v24  ;;  %v791_v30 = vand.u32 2147483647, %v781_v24  ;;  %vm787_vm3 = vweird.f32 %v781_v24 }
 0x2f7   : > { %v794_v32 = vor.u32 1.1754944e-38, %v793_v28  ;;  %vm792_vm5 = vcmp.eq.f32.partialorder %v791_v30, 8.507059e+37 }
 0x2fb   : > { %v1766_v25 = vpop.eup %1765 }
 0x2fc   : > { %v783_v26 = vmul.f32 %v1766_v25, %v781_v24  ;;  %vm788_vm2 = vweird.f32 %v1766_v25 }
 0x2fd   : > { %vm789_vm4 = vmor %vm787_vm3, %vm788_vm2 }
 0x2fe   : > { %v784_v27 = vsub.f32 1.0, %v783_v26 }
 0x300   : > { %v785_v29 = vmul.f32 %v1766_v25, %v784_v27 }
 0x302   : > { %v786_v31 = vadd.f32 %v1766_v25, %v785_v29 }
 0x304   : > { %v790_v33 = vsel %vm789_vm4, %v1766_v25, %v786_v31 }
 0x305   : > { %v795_v34 = vsel %vm792_vm5, %v794_v32, %v790_v33 }
 0x306   : > { %v796_v35 = vmul.f32 %v1764_v21, %v795_v34 }
 0x308   : > { %1642 = vst.msk [vmem:[%s2481_s27 + $0x8] sm:$0xff] %vm690_vm1, %v796_v35  ;;  %1643 = vmatmul.msk.f32.vlgmr.msra.gmra.mxu3 %vm690_vm1, %v796_v35 }
 0x309   : > { %1652 = vmatpush.xpose.msk.msra.mxu3 %vm663_vm0, %v1024_v7 }
 0x30c   : > { %v837_v36 = vpop.permute.xlu1 %836 }
 0x310   : > { %1645 = vmatmul.msk.f32.vlgmr.msrb.gmra.mxu3 %vm663_vm0, %v837_v36 }
 0x311   : > { %1660 = vmatpush.xpose.msk.msrb.mxu3 %vm663_vm0, %v1208_v9 }
 0x314   : > { %v1205_v37 = vpop.permute.xlu1 %1204 }
 0x318   : > { %1653 = vmatmul.msk.f32.vlgmr.msra.gmra.mxu3 %vm663_vm0, %v1021_v8 }
 0x320   : > { %1661 = vmatmul.msk.f32.vlgmr.msrb.gmra.mxu3 %vm663_vm0, %v1205_v37 }
 0x33f   : > { %v959_v38 = vpop.xlane.xlu1 %958 }
 0x340   : > { %v960_v39 = vsub.f32 %v954_v13, %v959_v38 }
 0x342   : > { %v961_v40 = vmul.f32 1.442695, %v960_v39 }
 0x344   : > { %1767 = vpow2.f32 %v961_v40 }
 0x345   : > { %1769 = vpow2.f32 %v1329_v48 }
 0x346   : > { %1771 = vpow2.f32 %v695_v52 }
 0x347   : > { %1773 = vpow2.f32 %v1145_v58 }
 0x34a   : > { %v1768_v41 = vpop.eup %1767 }
 0x34b   : > { %v963_v42 = vsel %vm690_vm1, %v1768_v41, 0.0  ;;  %v2496_v53 = vpop.eup %1769 }
 0x34c   : > { %964 = vadd.xlane.f32.xlu2 %v963_v42  ;;  %v1331_v57 = vsel %vm690_vm1, %v2496_v53, 0.0  ;;  %v2502_v60 = vpop.eup %1771 }
 0x34d   : > { %v697_v62 = vsel %vm690_vm1, %v2502_v60, 0.0  ;;  %v2507_v0 = vpop.eup %1773 }
 0x34e   : > { %v1147_v1 = vsel %vm690_vm1, %v2507_v0, 0.0 }
 0x38b   : > { %v2492_v47 = vpop.f32.mrf.mxu3 }
 0x393   : > { %v862_v50 = vpop.f32.mrf.mxu3 }
 0x394   : > { %v865_v51 = vsel %vm690_vm1, %v862_v50, -inf }
 0x395   : > { %866 = vmax.xlane.f32.xlu0 %v865_v51 }
 0x39b   : > { %v1046_v55 = vpop.f32.mrf.mxu3 }
 0x39c   : > { %v1049_v56 = vsel %vm690_vm1, %v1046_v55, -inf }
 0x39d   : > { %1050 = vmax.xlane.f32.xlu1 %v1049_v56  ;;  %1332 = vadd.xlane.f32.xlu0 %v1331_v57 }
 0x3a3   : > { %v1230_v61 = vpop.f32.mrf.mxu3 }
 0x3a4   : > { %v1233_v63 = vsel %vm690_vm1, %v1230_v61, -inf }
 0x3a5   : > { %698 = vadd.xlane.f32.xlu1 %v697_v62  ;;  %1234 = vmax.xlane.f32.xlu0 %v1233_v63 }
 0x3ad   : > { %1148 = vadd.xlane.f32.xlu1 %v1147_v1 }
 0x3b9   : > { %892 = vrot.lane.b32.xlu0 %v2434_v59, %s2027_s8 }
 0x3bf   : > { %v965_v2 = vpop.xlane.xlu2 %964 }
 0x3c0   : > { %1775 = vrcp.f32 %v965_v2  ;;  %v977_v6 = vand.u32 2147483648, %v965_v2  ;;  %v975_v8 = vand.u32 2147483647, %v965_v2  ;;  %vm971_vm7 = vweird.f32 %v965_v2 }
 0x3c2   : > { %v978_v10 = vor.u32 1.1754944e-38, %v977_v6  ;;  %vm976_vm9 = vcmp.eq.f32.partialorder %v975_v8, 8.507059e+37 }
 0x3c6   : > { %v1776_v3 = vpop.eup %1775  ;;  %984 = vrot.lane.b32.xlu1 %v2434_v59, %s2028_s19 }
 0x3c7   : > { %v967_v4 = vmul.f32 %v1776_v3, %v965_v2  ;;  %vm972_vm6 = vweird.f32 %v1776_v3 }
 0x3c8   : > { %vm973_vm8 = vmor %vm971_vm7, %vm972_vm6 }
 0x3c9   : > { %v968_v5 = vsub.f32 1.0, %v967_v4 }
 0x3cb   : > { %v969_v7 = vmul.f32 %v1776_v3, %v968_v5 }
 0x3cd   : > { %v970_v9 = vadd.f32 %v1776_v3, %v969_v7 }
 0x3ce   : > { %1076 = vrot.lane.b32.xlu1 %v2434_v59, %s2029_s12 }
 0x3cf   : > { %v974_v11 = vsel %vm973_vm8, %v1776_v3, %v970_v9 }
 0x3d0   : > { %v979_v12 = vsel %vm976_vm9, %v978_v10, %v974_v11 }
 0x3d1   : > { %v2517_v13 = vmul.f32 %v1768_v41, %v979_v12 }
 0x3d3   : > { %1650 = vst.msk [vmem:[%s2481_s27 + $0x18] sm:$0xff] %vm690_vm1, %v2517_v13 }
 0x3d6   : > { %1260 = vrot.lane.b32.xlu1 %v2434_v59, %s2031_s28 }
 0x408   : > { %v867_v14 = vpop.xlane.xlu0 %866 }
 0x409   : > { %v868_v15 = vsub.f32 %v862_v50, %v867_v14 }
 0x40b   : > { %v869_v16 = vmul.f32 1.442695, %v868_v15 }
 0x40d   : > { %1777 = vpow2.f32 %v869_v16 }
 0x410   : > { %v1051_v17 = vpop.xlane.xlu1 %1050  ;;  %v1333_v18 = vpop.xlane.xlu0 %1332 }
 0x411   : > { %v1052_v19 = vsub.f32 %v1046_v55, %v1051_v17  ;;  %1779 = vrcp.f32 %v1333_v18  ;;  %v1343_v30 = vand.u32 2147483647, %v1333_v18  ;;  %v1345_v31 = vand.u32 2147483648, %v1333_v18 }
 0x412   : > { %vm1339_vm11 = vweird.f32 %v1333_v18 }
 0x413   : > { %v2524_v20 = vpop.eup %1777  ;;  %v1053_v21 = vmul.f32 1.442695, %v1052_v19  ;;  %v1346_v37 = vor.u32 1.1754944e-38, %v1345_v31  ;;  %vm1344_vm13 = vcmp.eq.f32.partialorder %v1343_v30, 8.507059e+37 }
 0x414   : > { %v871_v22 = vsel %vm690_vm1, %v2524_v20, 0.0 }
 0x415   : > { %1781 = vpow2.f32 %v1053_v21  ;;  %872 = vadd.xlane.f32.xlu0 %v871_v22 }
 0x417   : > { %v1780_v23 = vpop.eup %1779 }
 0x418   : > { %v1335_v24 = vmul.f32 %v1780_v23, %v1333_v18  ;;  %v699_v25 = vpop.xlane.xlu1 %698  ;;  %v1235_v26 = vpop.xlane.xlu0 %1234  ;;  %vm1340_vm10 = vweird.f32 %v1780_v23 }
 0x419   : > { %1783 = vrcp.f32 %v699_v25  ;;  %v1236_v28 = vsub.f32 %v1230_v61, %v1235_v26  ;;  %vm1341_vm12 = vmor %vm1339_vm11, %vm1340_vm10  ;;  %v711_v44 = vand.u32 2147483648, %v699_v25  ;;  %v709_v48 = vand.u32 2147483647, %v699_v25 }
 0x41a   : > { %v1336_v27 = vsub.f32 1.0, %v1335_v24  ;;  %vm705_vm15 = vweird.f32 %v699_v25 }
 0x41b   : > { %v2528_v29 = vpop.eup %1781  ;;  %v1237_v33 = vmul.f32 1.442695, %v1236_v28  ;;  %v712_v52 = vor.u32 1.1754944e-38, %v711_v44  ;;  %vm710_vm3 = vcmp.eq.f32.partialorder %v709_v48, 8.507059e+37 }
 0x41c   : > { %v1337_v32 = vmul.f32 %v1780_v23, %v1336_v27  ;;  %v1055_v34 = vsel %vm690_vm1, %v2528_v29, 0.0 }
 0x41d   : > { %1056 = vadd.xlane.f32.xlu2 %v1055_v34  ;;  %1785 = vpow2.f32 %v1237_v33 }
 0x41e   : > { %v1338_v35 = vadd.f32 %v1780_v23, %v1337_v32 }
 0x41f   : > { %v1784_v36 = vpop.eup %1783 }
 0x420   : > { %v1342_v38 = vsel %vm1341_vm12, %v1780_v23, %v1338_v35  ;;  %v701_v39 = vmul.f32 %v1784_v36, %v699_v25  ;;  %v1149_v40 = vpop.xlane.xlu1 %1148  ;;  %vm706_vm14 = vweird.f32 %v1784_v36 }
 0x421   : > { %v1347_v41 = vsel %vm1344_vm13, %v1346_v37, %v1342_v38  ;;  %1787 = vrcp.f32 %v1149_v40  ;;  %vm707_vm2 = vmor %vm705_vm15, %vm706_vm14  ;;  %v1161_v58 = vand.u32 2147483648, %v1149_v40  ;;  %v1159_v63 = vand.u32 2147483647, %v1149_v40 }
 0x422   : > { %v702_v42 = vsub.f32 1.0, %v701_v39  ;;  %v2533_v43 = vmul.f32 %v2496_v53, %v1347_v41  ;;  %vm1155_vm5 = vweird.f32 %v1149_v40 }
 0x423   : > { %v2535_v45 = vpop.eup %1785  ;;  %v1162_v2 = vor.u32 1.1754944e-38, %v1161_v58  ;;  %vm1160_vm7 = vcmp.eq.f32.partialorder %v1159_v63, 8.507059e+37  ;;  %v1393_v63 = vld [vmem:[#allocation12 + $0x40] sm:$0xff] }
 0x424   : > { %v703_v46 = vmul.f32 %v1784_v36, %v702_v42  ;;  %1666 = vst.msk [vmem:[%s2481_s27 + $0x38] sm:$0xff] %vm690_vm1, %v2533_v43  ;;  %v1239_v49 = vsel %vm690_vm1, %v2535_v45, 0.0 }
 0x425   : > { %1240 = vadd.xlane.f32.xlu2 %v1239_v49 }
 0x426   : > { %v704_v50 = vadd.f32 %v1784_v36, %v703_v46 }
 0x427   : > { %v1788_v51 = vpop.eup %1787 }
 0x428   : > { %v1151_v53 = vmul.f32 %v1788_v51, %v1149_v40  ;;  %v708_v54 = vsel %vm707_vm2, %v1784_v36, %v704_v50  ;;  %vm1156_vm4 = vweird.f32 %v1788_v51 }
 0x429   : > { %1352 = vrot.lane.b32.xlu0 %v2434_v59, %s2032_s1  ;;  %v713_v55 = vsel %vm710_vm3, %v712_v52, %v708_v54  ;;  %vm1157_vm6 = vmor %vm1155_vm5, %vm1156_vm4  ;;  %v1400_v52 = vld [vmem:[#allocation12 + $0x78] sm:$0xff]  ;;  %v1398_v54 = vld [vmem:[#allocation12 + $0x68] sm:$0xff] }
 0x42a   : > { %v1152_v56 = vsub.f32 1.0, %v1151_v53  ;;  %v714_v57 = vmul.f32 %v2502_v60, %v713_v55  ;;  %v1399_v53 = vld [vmem:[#allocation12 + $0x70] sm:$0xff]  ;;  %1405 = vmatpush.msra.mxu3 %v1400_v52  ;;  %v1397_v55 = vld [vmem:[#allocation12 + $0x60] sm:$0xff] }
 0x42b   : > { %v893_v61 = vpop.permute.xlu0 %892 }
 0x42c   : > { %v1153_v62 = vmul.f32 %v1788_v51, %v1152_v56  ;;  %715 = vst.msk [vmem:[%s2481_s27] sm:$0xff] %vm690_vm1, %v714_v57  ;;  %1639 = vmatmul.msk.f32.vlgmr.msrb.gmra.mxu2 %vm690_vm1, %v714_v57  ;;  %913 = vmatpush.msra.mxu0 %v893_v61  ;;  %v1396_v56 = vld [vmem:[#allocation12 + $0x58] sm:$0xff]  ;;  %v1395_v57 = vld [vmem:[#allocation12 + $0x50] sm:$0xff] }
 0x42d   : > { %1406 = vmatpush.msra.mxu3 %v1399_v53 }
 0x42e   : > { %v1154_v1 = vadd.f32 %v1788_v51, %v1153_v62  ;;  %v1394_v62 = vld [vmem:[#allocation12 + $0x48] sm:$0xff] }
 0x42f   : > { %1407 = vmatpush.msra.mxu3 %v1398_v54 }
 0x430   : > { %v1158_v3 = vsel %vm1157_vm6, %v1788_v51, %v1154_v1  ;;  %vm830_vm6 = vcmask 261248   ;;  %v1392_v1 = vld [vmem:[#allocation12 + $0x38] sm:$0xff] }
 0x431   : > { %v1163_v4 = vsel %vm1160_vm7, %v1162_v2, %v1158_v3  ;;  %827 = vrot.lane.b32.xlu0 %v2492_v47, %s2032_s1  ;;  %1408 = vmatpush.msra.mxu3 %v1397_v55  ;;  %v1391_v2 = vld [vmem:[#allocation12 + $0x30] sm:$0xff]  ;;  %v1390_v3 = vld [vmem:[#allocation12 + $0x28] sm:$0xff]  ;;  %vm1106_vm7 = vcmask 654848  }
 0x432   : > { %v1164_v60 = vmul.f32 %v2507_v0, %v1163_v4  ;;  %v1389_v4 = vld [vmem:[#allocation12 + $0x20] sm:$0xff] }
 0x433   : > { %1409 = vmatpush.msra.mxu3 %v1396_v56 }
 0x434   : > { %1658 = vst.msk [vmem:[%s2481_s27 + $0x28] sm:$0xff] %vm690_vm1, %v1164_v60 }
 0x435   : > { %1410 = vmatpush.msra.mxu3 %v1395_v57 }
 0x437   : > { %1411 = vmatpush.msra.mxu3 %v1394_v62 }
 0x438   : > { %v985_v5 = vpop.permute.xlu1 %984 }
 0x439   : > { %1005 = vmatpush.msra.mxu2 %v985_v5  ;;  %1412 = vmatpush.msra.mxu3 %v1393_v63  ;;  %v1387_v5 = vld [vmem:[#allocation12 + $0x10] sm:$0xff] }
 0x43a   : > { %1651 = vmatmul.msk.f32.vlgmr.msra.gmra.mxu2 %vm690_vm1, %v2517_v13 }
 0x43b   : > { %1413 = vmatpush.msra.mxu3 %v1392_v1 }
 0x43d   : > { %1168 = vrot.lane.b32.xlu2 %v2434_v59, %s2030_s13  ;;  %1414 = vmatpush.msra.mxu3 %v1391_v2 }
 0x43f   : > { %1415 = vmatpush.msra.mxu3 %v1390_v3 }
 0x440   : > { %v1077_v6 = vpop.permute.xlu1 %1076 }
 0x441   : > { %1097 = vmatpush.msrb.mxu0 %v1077_v6  ;;  %1416 = vmatpush.msra.mxu3 %v1389_v4  ;;  %v1386_v6 = vld [vmem:[#allocation12 + $0x8] sm:$0xff] }
 0x448   : > { %v1261_v25 = vpop.permute.xlu1 %1260 }
 0x488   : > { %v873_v7 = vpop.xlane.xlu0 %872 }
 0x489   : > { %1789 = vrcp.f32 %v873_v7  ;;  %v885_v0 = vand.u32 2147483648, %v873_v7  ;;  %v883_v12 = vand.u32 2147483647, %v873_v7  ;;  %vm879_vm9 = vweird.f32 %v873_v7 }
 0x48b   : > { %v886_v13 = vor.u32 1.1754944e-38, %v885_v0  ;;  %vm884_vm11 = vcmp.eq.f32.partialorder %v883_v12, 8.507059e+37 }
 0x48f   : > { %v1790_v8 = vpop.eup %1789 }
 0x490   : > { %v875_v9 = vmul.f32 %v1790_v8, %v873_v7  ;;  %v1057_v10 = vpop.xlane.xlu2 %1056  ;;  %vm880_vm8 = vweird.f32 %v1790_v8  ;;  %v1385_v7 = vld [vmem:[#allocation12] sm:$0xff] }
 0x491   : > { %1791 = vrcp.f32 %v1057_v10  ;;  %vm881_vm10 = vmor %vm879_vm9, %vm880_vm8  ;;  %v1069_v21 = vand.u32 2147483648, %v1057_v10  ;;  %v1067_v24 = vand.u32 2147483647, %v1057_v10  ;;  %vm1063_vm13 = vweird.f32 %v1057_v10 }
 0x492   : > { %v876_v47 = vsub.f32 1.0, %v875_v9  ;;  %vm1198_vm8 = vcmask 786048   ;;  %vm1290_vm9 = vcmask 917248  }
 0x493   : > { %v1070_v27 = vor.u32 1.1754944e-38, %v1069_v21  ;;  %vm1068_vm15 = vcmp.eq.f32.partialorder %v1067_v24, 8.507059e+37 }
 0x494   : > { %v877_v11 = vmul.f32 %v1790_v8, %v876_v47 }
 0x496   : > { %v878_v14 = vadd.f32 %v1790_v8, %v877_v11 }
 0x497   : > { %v1792_v15 = vpop.eup %1791 }
 0x498   : > { %v882_v59 = vsel %vm881_vm10, %v1790_v8, %v878_v14  ;;  %v1059_v16 = vmul.f32 %v1792_v15, %v1057_v10  ;;  %v1241_v18 = vpop.xlane.xlu2 %1240  ;;  %vm1064_vm12 = vweird.f32 %v1792_v15  ;;  %vm1382_vm10 = vcmask 1048448  }
 0x499   : > { %v887_v17 = vsel %vm884_vm11, %v886_v13, %v882_v59  ;;  %1793 = vrcp.f32 %v1241_v18  ;;  %vm1065_vm14 = vmor %vm1063_vm13, %vm1064_vm12  ;;  %v1253_v36 = vand.u32 2147483648, %v1241_v18  ;;  %v1251_v38 = vand.u32 2147483647, %v1241_v18 }
 0x49a   : > { %v1060_v19 = vsub.f32 1.0, %v1059_v16  ;;  %v888_v22 = vmul.f32 %v2524_v20, %v887_v17  ;;  %vm1247_vm3 = vweird.f32 %v1241_v18 }
 0x49b   : > { %v1353_v35 = vpop.permute.xlu0 %1352  ;;  %v1254_v40 = vor.u32 1.1754944e-38, %v1253_v36  ;;  %vm1252_vm5 = vcmp.eq.f32.partialorder %v1251_v38, 8.507059e+37 }
 0x49c   : > { %v1061_v23 = vmul.f32 %v1792_v15, %v1060_v19  ;;  %1646 = vst.msk [vmem:[%s2481_s27 + $0x10] sm:$0xff] %vm690_vm1, %v888_v22  ;;  %1647 = vmatmul.msk.f32.vlgmr.msra.gmra.mxu0 %vm690_vm1, %v888_v22 }
 0x49d   : > { %1281 = vmatpush.msra.mxu0 %v1261_v25 }
 0x49e   : > { %v1062_v26 = vadd.f32 %v1792_v15, %v1061_v23 }
 0x49f   : > { %v1794_v28 = vpop.eup %1793 }
 0x4a0   : > { %v1066_v30 = vsel %vm1065_vm14, %v1792_v15, %v1062_v26  ;;  %v1243_v32 = vmul.f32 %v1794_v28, %v1241_v18  ;;  %v1169_v20 = vpop.permute.xlu2 %1168  ;;  %vm1248_vm2 = vweird.f32 %v1794_v28 }
 0x4a1   : > { %v1071_v31 = vsel %vm1068_vm15, %v1070_v27, %v1066_v30  ;;  %1189 = vmatpush.msrb.mxu2 %v1169_v20  ;;  %vm1249_vm4 = vmor %vm1247_vm3, %vm1248_vm2 }
 0x4a2   : > { %v1072_v33 = vmul.f32 %v2528_v29, %v1071_v31  ;;  %v1244_v34 = vsub.f32 1.0, %v1243_v32  ;;  %1659 = vmatmul.msk.f32.vlgmr.msrb.gmra.mxu2 %vm690_vm1, %v1164_v60  ;;  %v1388_v60 = vld [vmem:[#allocation12 + $0x18] sm:$0xff] }
 0x4a3   : > { %1373 = vmatpush.msra.mxu2 %v1353_v35  ;;  %v828_v46 = vpop.permute.xlu0 %827  ;;  %1417 = vmatpush.msra.mxu3 %v1388_v60 }
 0x4a4   : > { %1654 = vst.msk [vmem:[%s2481_s27 + $0x20] sm:$0xff] %vm690_vm1, %v1072_v33  ;;  %v1245_v37 = vmul.f32 %v1794_v28, %v1244_v34  ;;  %1655 = vmatmul.msk.f32.vlgmr.msrb.gmra.mxu0 %vm690_vm1, %v1072_v33 }
 0x4a5   : > { %1418 = vmatpush.msra.mxu3 %v1387_v5 }
 0x4a6   : > { %v1246_v39 = vadd.f32 %v1794_v28, %v1245_v37 }
 0x4a7   : > { %1419 = vmatpush.msra.mxu3 %v1386_v6 }
 0x4a8   : > { %v1250_v41 = vsel %vm1249_vm4, %v1794_v28, %v1246_v39 }
 0x4a9   : > { %v1255_v29 = vsel %vm1252_vm5, %v1254_v40, %v1250_v41  ;;  %1420 = vmatpush.msra.mxu3 %v1385_v7 }
 0x4aa   : > { %1667 = vmatmul.msk.f32.vlgmr.msra.gmra.mxu2 %vm690_vm1, %v2533_v43  ;;  %v1256_v42 = vmul.f32 %v2535_v45, %v1255_v29 }
 0x4ac   : > { %1662 = vst.msk [vmem:[%s2481_s27 + $0x30] sm:$0xff] %vm690_vm1, %v1256_v42  ;;  %1663 = vmatmul.msk.f32.vlgmr.msra.gmra.mxu0 %vm690_vm1, %v1256_v42  ;;  %vm1014_vm1 = vcmask 523648  }
 0x4af   : > { %v736_v44 = vpop.f32.mrf.mxu2 }
 0x4b0   : > { %739 = vst.msk [vmem:[#allocation5] sm:$0xff] %vm663_vm0, %v736_v44  ;;  %vm922_vm0 = vcmask 392448  }
 0x4b1   : > { %831 = vst.msk [vmem:[#allocation5] sm:$0xff] %vm830_vm6, %v828_v46 }
 0x4bd   : > { %v1007_v48 = vpop.f32.mrf.mxu2 }
 0x4be   : > { %1011 = vrot.lane.b32.xlu1 %v1007_v48, %s2030_s13  ;;  %s1935_s13 = scalar_lea.hbm %s2680_s20, 128 }
 0x519   : > { %v915_v49 = vpop.f32.mrf.mxu0 }
 0x51a   : > { %919 = vrot.lane.b32.xlu2 %v915_v49, %s2031_s28 }
 0x521   : > { %v1099_v50 = vpop.f32.mrf.mxu0 }
 0x522   : > { %1103 = vrot.lane.b32.xlu0 %v1099_v50, %s2029_s12 }
 0x525   : > { %v1191_v43 = vpop.f32.mrf.mxu2 }
 0x526   : > { %1195 = vrot.lane.b32.xlu2 %v1191_v43, %s2028_s19 }
 0x529   : > { %v1283_v45 = vpop.f32.mrf.mxu0 }
 0x52a   : > { %1287 = vrot.lane.b32.xlu1 %v1283_v45, %s2027_s8  ;;  %s1931_s8 = scalar_lea.hbm %s1930_s26, 64 }
 0x52b   : > { %p1932_p11 = scmp.ne.s32.totalorder %s1930_s26, %s1931_s8  ;;  %p1937_p2 = scmp.lt.s32.totalorder %s1935_s13, %s1931_s8 }
 0x52d   : > { %v1375_v51 = vpop.f32.mrf.mxu2  ;;  %p1933_p13 = pnand %p1932_p11, %p2139_p6  ;;  %p1938_p3 = por %p1937_p2, %p1936_p1 }
 0x52e   : > { %1379 = vrot.lane.b32.xlu0 %v1375_v51, %s2026_s9  ;;  %s1458_s9 = sshll.u32 %s2481_s27, 4  ;;  %s1459_s9 = int_to_ptr.vmem [resolvable:$true] %s1458_s9 }
 0x52f   : > { %p1934_p9 = pneg %p1933_p13 }
 0x530   : > { %v1012_v61 = vpop.permute.xlu1 %1011 }
 0x531   : > { %p1939_p8 = pnand %p1938_p3, %p1934_p9 }
 0x574   : > { %v920_v58 = vpop.permute.xlu2 %919 }
 0x575   : > { %923 = vst.msk [vmem:[#allocation5] sm:$0xff] %vm922_vm0, %v920_v58 }
 0x576   : > { %1015 = vst.msk [vmem:[#allocation5] sm:$0xff] %vm1014_vm1, %v1012_v61 }
 0x580   : > { %v1196_v9 = vpop.permute.xlu2 %1195 }
 0x594   : > { %v1104_v8 = vpop.permute.xlu0 %1103 }
 0x595   : > { %1107 = vst.msk [vmem:[#allocation5] sm:$0xff] %vm1106_vm7, %v1104_v8 }
 0x596   : > { %1199 = vst.msk [vmem:[#allocation5] sm:$0xff] %vm1198_vm8, %v1196_v9 }
 0x59c   : > { %v1288_v10 = vpop.permute.xlu1 %1287 }
 0x59d   : > { %1291 = vst.msk [vmem:[#allocation5] sm:$0xff] %vm1290_vm9, %v1288_v10 }
 0x5a0   : > { %v1380_v47 = vpop.permute.xlu0 %1379 }
 0x5a1   : > { %1383 = vst.msk [vmem:[#allocation5] sm:$0xff] %vm1382_vm10, %v1380_v47 }
 0x5a8   : > { %v1384_v0 = vld [vmem:[#allocation5] sm:$0xff] }
 0x5a9   : > { %1421 = vmatmul.f32.vlgmr.msra.gmra.mxu3 %v1384_v0 }
 0x5aa   : > { %1942 = shalt.err (!%p1939_p8)
}
 0x5ab   : > { %s2033_s11 = smov 128   ;;  %s2034_s27 = smov 8  }
 0x5ac   : > { %1687 = dma.vmem_to_hbm [thread:$0]  (%p2139_p6), %s1459_s9, 1024, %s1461_s30, %s1432_s29, %s2033_s11, %s2033_s11, %s2034_s27  }
 0x5ad   : > { %s1670_s15 = sshll.u32 %s2121_s25, 3  ;;  %s2681_s24 = sld [smem:[#allocation33_spill]] }
 0x5ae   : > { %s2683_s8 = sld [smem:[#allocation32_spill]]  ;;  %s526_s13 = scalar_lea.vmem [#allocation14], %s2250_s17 }
 0x5af   : > { %s1444_s28 = sshll.u32 %s526_s13, 4  ;;  %s1427_s0 = scalar_lea.sflag [#allocation8], %s2247_s16  ;;  %s1445_s28 = int_to_ptr.vmem [resolvable:$true] %s1444_s28 }
 0x5b3   : > { %s2682_s14 = smov %s2681_s24  ;;  %s1442_s19 = scalar_lea.hbm %s2681_s24, %s1670_s15 }
 0x5b4   : > { %v1762_v11 = vld [vmem:[%s2683_s8] ss:$0 sm:$0xff]  ;;  %s1446_s1 = sshll.u32 %s1442_s19, 4  ;;  %s1963_s11 = scalar_lea.hbm %s2682_s14, 16  ;;  %s1447_s1 = int_to_ptr.hbm [resolvable:$true] %s1446_s1 }
 0x5b5   : > { %s1957_s9 = sshra.s32 %s1447_s1, 4  ;;  %s1958_s9 = int_to_ptr.hbm [resolvable:$true] %s1957_s9 }
 0x5b6   : > { %s1959_s25 = scalar_lea.hbm %s1958_s9, 8  ;;  %p1964_p4 = scmp.lt.s32.totalorder %s1958_s9, %s2682_s14 }
 0x5b7   : > { %p1960_p7 = scmp.ne.s32.totalorder %s1958_s9, %s1959_s25  ;;  %p1965_p5 = scmp.lt.s32.totalorder %s1963_s11, %s1959_s25 }
 0x5b9   : > { %p1961_p12 = pnand %p1960_p7, %p2139_p6  ;;  %p1966_p11 = por %p1965_p5, %p1964_p4 }
 0x5bb   : > { %p1962_p0 = pneg %p1961_p12 }
 0x5bd   : > { %p1967_p13 = pnand %p1966_p11, %p1962_p0 }
 0x62c   : > { %v1422_v12 = vpop.f32.mrf.mxu3 }
 0x62d   : > { %v1423_v14 = vadd.f32 %v1762_v11, %v1422_v12 }
 0x62f   : > { %1425 = vst [vmem:[%s526_s13] sm:$0xff] %v1423_v14 }
 0x630   : > { %1970 = shalt.err (!%p1967_p13)
}
 0x631   : > { %1686 = dma.vmem_to_hbm [thread:$0]  (%p2139_p6), %s1445_s28, 128, %s1447_s1, %s1427_s0  }
 0x632 PF: > { %s2684_s16 = sld [smem:[#allocation22_spill]] }
 0x633   : > { %s2686_s18 = sld [smem:[#allocation23_spill]] }
 0x638   : > { %s1475_s21 = sand.u32 1, %s2684_s16  }
 0x639   : > { %p2687_p9 = scmp.ge.s32.totalorder %s2686_s18, 2  ;;  %s1476_s24 = scalar_lea.sflag [#allocation8], %s1475_s21 }
 0x63b   : > { %p1705_p1 = pnand %p2687_p9, %p2148_p10 }
 0x63d   : > { %p1706_p2 = pneg %p1705_p1 }
 0x63f   : > { %2000 = dma.done.wait (%p1706_p2), %s1476_s24, 128  }
 0x640   : > { %2002 = vsyncadd (%p1706_p2), %s1476_s24, 4294967168  ;;  %s1486_s19 = scalar_lea.sflag [#allocation16], %s1475_s21 }
 0x641   : > { %2004 = dma.done.wait (%p1706_p2), %s1486_s19, 1024  }
 0x642   : > { %2006 = vsyncadd (%p1706_p2), %s1486_s19, 4294966272  ;;  %s2688_s24 = sld [smem:[#allocation24_spill]]  ;;  %s2690_s21 = smov %s2013_s22 }
 0x643   : > { %s2689_s10 = sld [smem:[#allocation25_spill]]  ;;  %s2691_s22 = smov %s2017_s23 }
 0x648   : > { %p33_p6 = scmp.ge.s32.totalorder %s2688_s24, 4  }
 0x649   : > { %s2692_s23 = smov %s2689_s10 }
 0x64a   :  { %35 = sbr.rel (!%p33_p6) target bundleno = 18 (0x12), region = 161 }
 0x64f   :  { %1492 = vsyncpa [#allocation7], 1 }
 0x650   :  { %1494 = vsyncpa [#allocation7 + $0x1], 1 }
 0x651   :  { %1495 = vsyncpa [#allocation10], 1 }
 0x652   :  { %1497 = vsyncpa [#allocation10 + $0x1], 1 }
 0x653   :  { %1498 = vsyncpa [#allocation13], 1 }
 0x654   :  { %1499 = vsyncpa [#allocation8], 1 }
 0x655   :  { %1501 = vsyncpa [#allocation8 + $0x1], 1 }
 0x656   :  { %1502 = vsyncpa [#allocation16], 1 }
 0x657   :  { %1504 = vsyncpa [#allocation16 + $0x1], 1 }

</bundles_post_ra>
